<compile_context>
chip_gen: v6e
topology: v6e:2x2x1
jax: 0.10.0
libtpu: 0.0.40
codegen_flags: <defaults>
</compile_context>

<pallas_src>
import functools
import math

import jax
import jax.numpy as jnp
from jax.experimental import pallas as pl
from jax.experimental.pallas import tpu as pltpu

X_DIMS = 2
Z_DIMS = 20
Y_DIMS = 2
PX_SIGMA = 0.08
H1, H2, H3 = 128, 256, 128

HEAD_PAD = 24          # sublane-aligned row offset of the pre-softplus head
DATA_ROWS = 32         # rows 0:2 x, 2:4 y, 4:8 pad, 8:28 eps, 28:32 pad
EPS_OFF = 8
DEFAULT_TILE_B = 1024  # batch tile (lane dim); wrapper caps it per batch size

_LOG_2PI = math.log(2.0 * math.pi)
_LOG_PX_SIGMA = math.log(PX_SIGMA)


def _softplus(v):
    # matches F.softplus(beta=1, threshold=20)
    return jnp.where(v > 20.0, v, jnp.log1p(jnp.exp(jnp.minimum(v, 20.0))))


def _default_bf16_act():
    """bf16 elementwise only where the VPU supports it (v6e / v7x)."""
    try:
        kind = jax.devices()[0].device_kind.lower()
    except Exception:
        return False
    return ("v6" in kind) or ("v7" in kind)


def cvae_halfmoon_kernel(
    # data slab, feature-major [DATA_ROWS, TILE_B] f32
    data_ref,
    # q_z encoder params
    qw1_ref, qb1_ref, qw2_ref, qb2_ref, qw3_ref, qb3_ref, qhw_ref, qhb_ref,
    # p_x decoder params
    pw1z_ref, pw1y_ref, pb1_ref, pw2_ref, pb2_ref, pw3_ref, pb3_ref,
    pmu_w_ref, pmu_b_ref,
    # output: per-example elbo, lane-dense [1, TILE_B]
    elbo_ref,
    *, bf16_act,
):
    f32 = jnp.float32
    bf16 = jnp.bfloat16
    act = bf16 if bf16_act else f32

    # data slab slices (all sublane-aligned starts)
    xy8 = data_ref[0:8, :].astype(bf16)                # x|y|pad, K=8 for MXU
    eps24 = data_ref[EPS_OFF:EPS_OFF + HEAD_PAD, :]    # [24, TB], rows 20:24 = 0
    x0 = data_ref[0:1, :]
    x1 = data_ref[1:2, :]

    def mm(w_ref, rhs_bf16, out_dt):
        return jnp.dot(w_ref[...], rhs_bf16, preferred_element_type=out_dt)

    # ---------------- q_z(x, y) encoder ----------------
    # layer 1: K=8 padded bf16 MXU matmul over the xy slab (MXU has slack)
    h = mm(qw1_ref, xy8, act) + qb1_ref[...].astype(act)
    h = jnp.maximum(h, 0.0)
    h = mm(qw2_ref, h.astype(bf16), act) + qb2_ref[...].astype(act)
    h = jnp.maximum(h, 0.0)
    h = mm(qw3_ref, h.astype(bf16), act) + qb3_ref[...].astype(act)
    h = jnp.maximum(h, 0.0)

    # fused mu / pre-softplus head: one [48,128] matmul, f32 output
    head = mm(qhw_ref, h.astype(bf16), f32) + qhb_ref[...]        # [48, TB]
    qz_mu = head[0:HEAD_PAD, :]                                   # [24, TB]
    qz_std = _softplus(head[HEAD_PAD:2 * HEAD_PAD, :])            # [24, TB]
    z = qz_mu + eps24 * qz_std                                    # reparameterize

    # ---------------- p_x(z, y) decoder ----------------
    # layer 1: z part (K padded 20->24) + y part (reuses the bf16 xy slab)
    g = (mm(pw1z_ref, z.astype(bf16), act)
         + mm(pw1y_ref, xy8, act)
         + pb1_ref[...].astype(act))
    g = jnp.maximum(g, 0.0)
    g = mm(pw2_ref, g.astype(bf16), act) + pb2_ref[...].astype(act)
    g = jnp.maximum(g, 0.0)
    g = mm(pw3_ref, g.astype(bf16), act) + pb3_ref[...].astype(act)
    g = jnp.maximum(g, 0.0)

    # px_mu head: N padded 2 -> 8, one tiny MXU pass, f32 output
    px_head = mm(pmu_w_ref, g.astype(bf16), f32)                  # [8, TB]
    mu0 = px_head[0:1, :] + pmu_b_ref[0:1, :]
    mu1 = px_head[1:2, :] + pmu_b_ref[1:2, :]

    # x_hat = px_mu + eps_x * px_sigma never feeds the returned loss -> dropped

    # ---------------- ELBO ----------------
    inv_s = 1.0 / PX_SIGMA
    d0 = (x0 - mu0) * inv_s
    d1 = (x1 - mu1) * inv_s
    log_px = (-0.5 * (d0 * d0 + d1 * d1)
              - X_DIMS * (_LOG_PX_SIGMA + 0.5 * _LOG_2PI))         # [1, TB]

    # KL(N(mu, std) || N(0, 1)) on the full 24-row slab; pad rows (>= Z_DIMS)
    # are masked only in the final sum so all earlier math is whole-vreg.
    row = jax.lax.broadcasted_iota(jnp.int32, (HEAD_PAD, 1), 0)
    kl_terms = (-jnp.log(qz_std)
                + 0.5 * (qz_std * qz_std + qz_mu * qz_mu) - 0.5)
    kl = jnp.sum(jnp.where(row < Z_DIMS, kl_terms, 0.0),
                 axis=0, keepdims=True)                            # [1, TB]

    elbo_ref[...] = log_px - kl                                    # lane-dense


def init_params(key):
    """PyTorch-style Linear init; weights kept in [out, in] layout, padded for
    MXU-friendly shapes, MXU weights stored in bf16."""
    def linear(k, fan_in, fan_out):
        k1, k2 = jax.random.split(k)
        bound = 1.0 / math.sqrt(fan_in)
        w = jax.random.uniform(k1, (fan_out, fan_in), jnp.float32, -bound, bound)
        b = jax.random.uniform(k2, (fan_out, 1), jnp.float32, -bound, bound)
        return w, b

    keys = jax.random.split(key, 9)
    qw1, qb1 = linear(keys[0], X_DIMS + Y_DIMS, H1)   # [128, 4]
    qw2, qb2 = linear(keys[1], H1, H2)                # [256, 128]
    qw3, qb3 = linear(keys[2], H2, H3)                # [128, 256]
    qmw, qmb = linear(keys[3], H3, Z_DIMS)            # [20, 128]
    qsw, qsb = linear(keys[4], H3, Z_DIMS)            # [20, 128]
    pw1, pb1 = linear(keys[5], Z_DIMS + Y_DIMS, H1)   # [128, 22]
    pw2, pb2 = linear(keys[6], H1, H2)
    pw3, pb3 = linear(keys[7], H2, H3)
    pmw, pmb = linear(keys[8], H3, X_DIMS)            # [2, 128]

    bf16 = jnp.bfloat16

    # encoder layer 1: K padded 4 -> 8, columns [x(2) | y(2) | 0(4)]
    qw1_pad = jnp.zeros((H1, 8), jnp.float32).at[:, :X_DIMS + Y_DIMS].set(qw1)

    # fused mu / pre-softplus head: mu rows at 0, pre-softplus rows at 24
    qhw = jnp.zeros((2 * HEAD_PAD, H3), jnp.float32)
    qhw = qhw.at[0:Z_DIMS].set(qmw).at[HEAD_PAD:HEAD_PAD + Z_DIMS].set(qsw)
    qhb = jnp.zeros((2 * HEAD_PAD, 1), jnp.float32)
    qhb = qhb.at[0:Z_DIMS].set(qmb).at[HEAD_PAD:HEAD_PAD + Z_DIMS].set(qsb)

    # decoder layer 1: z columns padded 20 -> 24; y columns placed at offsets
    # 2:4 of an 8-wide block so the kernel can reuse the encoder's xy slab
    pw1z_pad = jnp.zeros((H1, HEAD_PAD), jnp.float32).at[:, :Z_DIMS].set(pw1[:, :Z_DIMS])
    pw1y_pad = jnp.zeros((H1, 8), jnp.float32).at[:, X_DIMS:X_DIMS + Y_DIMS].set(pw1[:, Z_DIMS:])

    # px_mu head: output rows padded 2 -> 8 for a single tiny MXU pass
    pmu_pad = jnp.zeros((8, H3), jnp.float32).at[0:X_DIMS].set(pmw)

    return (
        # encoder (MXU weights bf16, biases f32)
        qw1_pad.astype(bf16), qb1,
        qw2.astype(bf16), qb2,
        qw3.astype(bf16), qb3,
        qhw.astype(bf16), qhb,
        # decoder
        pw1z_pad.astype(bf16), pw1y_pad.astype(bf16), pb1,
        pw2.astype(bf16), pb2,
        pw3.astype(bf16), pb3,
        pmu_pad.astype(bf16), pmb,
    )


def cvae_halfmoon_forward(x, y, eps_z, params, *, tile_b=DEFAULT_TILE_B,
                          bf16_act=None):
    """Returns (-elbo.mean(), elbo) exactly like the PyTorch forward."""
    B = x.shape[0]
    if bf16_act is None:
        bf16_act = _default_bf16_act()

    # tile: multiple of 128, capped near B/2 so the batch grid keeps >= 2 steps
    # when possible (both TensorCores busy on v7x), capped at tile_b overall.
    max_tile = 128 * max(1, pl.cdiv(B, 2 * 128))
    tile = min(tile_b, max_tile)
    tile = max(128, (tile // 128) * 128)
    b_pad = pl.cdiv(B, tile) * tile

    # single feature-major data slab: one lane-dense DMA per grid step.
    data = jnp.zeros((DATA_ROWS, b_pad), jnp.float32)
    data = data.at[0:X_DIMS, :B].set(x.T)
    data = data.at[X_DIMS:X_DIMS + Y_DIMS, :B].set(y.T)
    data = data.at[EPS_OFF:EPS_OFF + Z_DIMS, :B].set(eps_z.T)

    data_spec = pl.BlockSpec((DATA_ROWS, tile), lambda i: (0, i))
    weight_specs = [pl.BlockSpec(p.shape, lambda i: (0, 0)) for p in params]

    kernel = functools.partial(cvae_halfmoon_kernel, bf16_act=bf16_act)

    elbo_row = pl.pallas_call(
        kernel,
        out_shape=jax.ShapeDtypeStruct((1, b_pad), jnp.float32),
        grid_spec=pltpu.PrefetchScalarGridSpec(
            num_scalar_prefetch=0,
            grid=(b_pad // tile,),
            in_specs=[data_spec] + weight_specs,
            out_specs=pl.BlockSpec((1, tile), lambda i: (0, i)),
        ),
        compiler_params=pltpu.CompilerParams(
            dimension_semantics=("parallel",),        # megacore-shardable
            vmem_limit_bytes=32 * 1024 * 1024,        # covers v5e's 16 MiB default
        ),
    )(data, *params)

    elbo = elbo_row[0, :B]                 # padded lanes are never reused
    neg_elbo = -jnp.mean(elbo)             # scalar mean stays in the wrapper
    return neg_elbo, elbo


def _reference_forward(x, y, eps_z, params):
    """Pure-JAX f32 reference using the same (bf16-quantized, padded) params."""
    (qw1, qb1, qw2, qb2, qw3, qb3, qhw, qhb,
     pw1z, pw1y, pb1, pw2, pb2, pw3, pb3, pmu_w, pmu_b) = [
        p.astype(jnp.float32) for p in params]

    xy = jnp.concatenate([x, y], axis=1)
    h = jax.nn.relu(xy @ qw1[:, :X_DIMS + Y_DIMS].T + qb1[:, 0])
    h = jax.nn.relu(h @ qw2.T + qb2[:, 0])
    h = jax.nn.relu(h @ qw3.T + qb3[:, 0])
    head = h @ qhw.T + qhb[:, 0]
    qz_mu = head[:, :Z_DIMS]
    qz_std = jax.nn.softplus(head[:, HEAD_PAD:HEAD_PAD + Z_DIMS])
    z = qz_mu + eps_z * qz_std

    g = jax.nn.relu(z @ pw1z[:, :Z_DIMS].T
                    + y @ pw1y[:, X_DIMS:X_DIMS + Y_DIMS].T + pb1[:, 0])
    g = jax.nn.relu(g @ pw2.T + pb2[:, 0])
    g = jax.nn.relu(g @ pw3.T + pb3[:, 0])
    px_mu = g @ pmu_w[:X_DIMS].T + pmu_b[:, 0]

    log_px = jnp.sum(-0.5 * ((x - px_mu) / PX_SIGMA) ** 2
                     - _LOG_PX_SIGMA - 0.5 * _LOG_2PI, axis=1)
    kl = jnp.sum(-jnp.log(qz_std) + 0.5 * (qz_std ** 2 + qz_mu ** 2) - 0.5, axis=1)
    elbo = log_px - kl
    return -jnp.mean(elbo), elbo


if __name__ == "__main__":
    key = jax.random.PRNGKey(0)
    kx, ky, kez, kp = jax.random.split(key, 4)

    B = 256                                            # 2 grid steps at tile=128
    x = jax.random.normal(kx, (B, X_DIMS), jnp.float32)       # half-moon points
    y = jax.random.normal(ky, (B, Y_DIMS), jnp.float32)       # condition
    eps_z = jax.random.normal(kez, (B, Z_DIMS), jnp.float32)  # replaces torch.randn

    params = init_params(kp)

    fwd = jax.jit(cvae_halfmoon_forward)
    neg_elbo, elbo = fwd(x, y, eps_z, params)
    jax.block_until_ready((neg_elbo, elbo))

    assert neg_elbo.shape == () and elbo.shape == (B,)
    assert bool(jnp.isfinite(neg_elbo)) and bool(jnp.all(jnp.isfinite(elbo)))

    # loose correctness check vs. a pure-JAX reference that uses the same
    # quantized weights; bf16 MXU / activation drift -> generous tolerances.
    ref_neg, ref_elbo = _reference_forward(x, y, eps_z, params)
    assert bool(jnp.allclose(neg_elbo, ref_neg, rtol=5e-2)), (neg_elbo, ref_neg)
    assert bool(jnp.allclose(elbo, ref_elbo, rtol=1e-1, atol=2.0))

    print("KERNEL_OK")
</pallas_src>

<mosaic_0001>
module attributes {stable_mosaic.version = 11 : i64} {
  func.func @cvae_halfmoon_kernel(%arg0: i32, %arg1: memref<32x128xf32, #tpu.memory_space<vmem>>, %arg2: memref<128x8xbf16, #tpu.memory_space<vmem>>, %arg3: memref<128x1xf32, #tpu.memory_space<vmem>>, %arg4: memref<256x128xbf16, #tpu.memory_space<vmem>>, %arg5: memref<256x1xf32, #tpu.memory_space<vmem>>, %arg6: memref<128x256xbf16, #tpu.memory_space<vmem>>, %arg7: memref<128x1xf32, #tpu.memory_space<vmem>>, %arg8: memref<48x128xbf16, #tpu.memory_space<vmem>>, %arg9: memref<48x1xf32, #tpu.memory_space<vmem>>, %arg10: memref<128x24xbf16, #tpu.memory_space<vmem>>, %arg11: memref<128x8xbf16, #tpu.memory_space<vmem>>, %arg12: memref<128x1xf32, #tpu.memory_space<vmem>>, %arg13: memref<256x128xbf16, #tpu.memory_space<vmem>>, %arg14: memref<256x1xf32, #tpu.memory_space<vmem>>, %arg15: memref<128x256xbf16, #tpu.memory_space<vmem>>, %arg16: memref<128x1xf32, #tpu.memory_space<vmem>>, %arg17: memref<8x128xbf16, #tpu.memory_space<vmem>>, %arg18: memref<2x1xf32, #tpu.memory_space<vmem>>, %arg19: memref<1x128xf32, #tpu.memory_space<vmem>>) attributes {dimension_semantics = [#tpu.dimension_semantics<parallel>], iteration_bounds = array<i64: 2>, scalar_prefetch = 0 : i64, scratch_operands = 0 : i64, tpu.core_type = #tpu.core_type<tc>, window_params = [{transform_indices = @transform_0, window_bounds = array<i64: 32, 128>}, {pipeline_mode = #tpu.pipeline_mode<synchronous>, transform_indices = @transform_1, window_bounds = array<i64: 128, 8>}, {pipeline_mode = #tpu.pipeline_mode<synchronous>, transform_indices = @transform_2, window_bounds = array<i64: 128, 1>}, {pipeline_mode = #tpu.pipeline_mode<synchronous>, transform_indices = @transform_3, window_bounds = array<i64: 256, 128>}, {pipeline_mode = #tpu.pipeline_mode<synchronous>, transform_indices = @transform_4, window_bounds = array<i64: 256, 1>}, {pipeline_mode = #tpu.pipeline_mode<synchronous>, transform_indices = @transform_5, window_bounds = array<i64: 128, 256>}, {pipeline_mode = #tpu.pipeline_mode<synchronous>, transform_indices = @transform_6, window_bounds = array<i64: 128, 1>}, {pipeline_mode = #tpu.pipeline_mode<synchronous>, transform_indices = @transform_7, window_bounds = array<i64: 48, 128>}, {pipeline_mode = #tpu.pipeline_mode<synchronous>, transform_indices = @transform_8, window_bounds = array<i64: 48, 1>}, {pipeline_mode = #tpu.pipeline_mode<synchronous>, transform_indices = @transform_9, window_bounds = array<i64: 128, 24>}, {pipeline_mode = #tpu.pipeline_mode<synchronous>, transform_indices = @transform_10, window_bounds = array<i64: 128, 8>}, {pipeline_mode = #tpu.pipeline_mode<synchronous>, transform_indices = @transform_11, window_bounds = array<i64: 128, 1>}, {pipeline_mode = #tpu.pipeline_mode<synchronous>, transform_indices = @transform_12, window_bounds = array<i64: 256, 128>}, {pipeline_mode = #tpu.pipeline_mode<synchronous>, transform_indices = @transform_13, window_bounds = array<i64: 256, 1>}, {pipeline_mode = #tpu.pipeline_mode<synchronous>, transform_indices = @transform_14, window_bounds = array<i64: 128, 256>}, {pipeline_mode = #tpu.pipeline_mode<synchronous>, transform_indices = @transform_15, window_bounds = array<i64: 128, 1>}, {pipeline_mode = #tpu.pipeline_mode<synchronous>, transform_indices = @transform_16, window_bounds = array<i64: 8, 128>}, {pipeline_mode = #tpu.pipeline_mode<synchronous>, transform_indices = @transform_17, window_bounds = array<i64: 2, 1>}, {transform_indices = @transform_18, window_bounds = array<i64: 1, 128>}]} {
    %c0 = arith.constant 0 : index
    %c0_0 = arith.constant 0 : index
    %0 = vector.load %arg1[%c0, %c0_0] : memref<32x128xf32, #tpu.memory_space<vmem>>, vector<8x128xf32>
    %1 = arith.truncf %0 : vector<8x128xf32> to vector<8x128xbf16>
    %c8 = arith.constant 8 : index
    %c0_1 = arith.constant 0 : index
    %2 = vector.load %arg1[%c8, %c0_1] : memref<32x128xf32, #tpu.memory_space<vmem>>, vector<24x128xf32>
    %c0_2 = arith.constant 0 : index
    %c0_3 = arith.constant 0 : index
    %3 = vector.load %arg1[%c0_2, %c0_3] : memref<32x128xf32, #tpu.memory_space<vmem>>, vector<1x128xf32>
    %c1 = arith.constant 1 : index
    %c0_4 = arith.constant 0 : index
    %4 = vector.load %arg1[%c1, %c0_4] : memref<32x128xf32, #tpu.memory_space<vmem>>, vector<1x128xf32>
    %c0_5 = arith.constant 0 : index
    %c0_6 = arith.constant 0 : index
    %5 = vector.load %arg2[%c0_5, %c0_6] : memref<128x8xbf16, #tpu.memory_space<vmem>>, vector<128x8xbf16>
    %cst = arith.constant dense<0.000000e+00> : vector<128x128xf32>
    %6 = tpu.matmul %5, %1, %cst {dimension_numbers = #tpu.dot_dimension_numbers<[1], [0], [0], [1], [0, 0, 1, 1], [], []>} : vector<128x8xbf16>, vector<8x128xbf16>, vector<128x128xf32> -> vector<128x128xf32>
    %c0_7 = arith.constant 0 : index
    %c0_8 = arith.constant 0 : index
    %7 = vector.load %arg3[%c0_7, %c0_8] : memref<128x1xf32, #tpu.memory_space<vmem>>, vector<128x1xf32>
    %8 = vector.broadcast %7 : vector<128x1xf32> to vector<128x128xf32>
    %9 = arith.addf %6, %8 : vector<128x128xf32>
    %cst_9 = arith.constant 0.000000e+00 : f32
    %10 = vector.broadcast %cst_9 : f32 to vector<128x128xf32>
    %11 = arith.maximumf %9, %10 : vector<128x128xf32>
    %12 = arith.truncf %11 : vector<128x128xf32> to vector<128x128xbf16>
    %c0_10 = arith.constant 0 : index
    %c0_11 = arith.constant 0 : index
    %13 = vector.load %arg4[%c0_10, %c0_11] : memref<256x128xbf16, #tpu.memory_space<vmem>>, vector<256x128xbf16>
    %cst_12 = arith.constant dense<0.000000e+00> : vector<256x128xf32>
    %14 = tpu.matmul %13, %12, %cst_12 {dimension_numbers = #tpu.dot_dimension_numbers<[1], [0], [0], [1], [0, 0, 1, 1], [], []>} : vector<256x128xbf16>, vector<128x128xbf16>, vector<256x128xf32> -> vector<256x128xf32>
    %c0_13 = arith.constant 0 : index
    %c0_14 = arith.constant 0 : index
    %15 = vector.load %arg5[%c0_13, %c0_14] : memref<256x1xf32, #tpu.memory_space<vmem>>, vector<256x1xf32>
    %16 = vector.broadcast %15 : vector<256x1xf32> to vector<256x128xf32>
    %17 = arith.addf %14, %16 : vector<256x128xf32>
    %cst_15 = arith.constant 0.000000e+00 : f32
    %18 = vector.broadcast %cst_15 : f32 to vector<256x128xf32>
    %19 = arith.maximumf %17, %18 : vector<256x128xf32>
    %20 = arith.truncf %19 : vector<256x128xf32> to vector<256x128xbf16>
    %c0_16 = arith.constant 0 : index
    %c0_17 = arith.constant 0 : index
    %21 = vector.load %arg6[%c0_16, %c0_17] : memref<128x256xbf16, #tpu.memory_space<vmem>>, vector<128x256xbf16>
    %cst_18 = arith.constant dense<0.000000e+00> : vector<128x128xf32>
    %22 = tpu.matmul %21, %20, %cst_18 {dimension_numbers = #tpu.dot_dimension_numbers<[1], [0], [0], [1], [0, 0, 1, 1], [], []>} : vector<128x256xbf16>, vector<256x128xbf16>, vector<128x128xf32> -> vector<128x128xf32>
    %c0_19 = arith.constant 0 : index
    %c0_20 = arith.constant 0 : index
    %23 = vector.load %arg7[%c0_19, %c0_20] : memref<128x1xf32, #tpu.memory_space<vmem>>, vector<128x1xf32>
    %24 = vector.broadcast %23 : vector<128x1xf32> to vector<128x128xf32>
    %25 = arith.addf %22, %24 : vector<128x128xf32>
    %cst_21 = arith.constant 0.000000e+00 : f32
    %26 = vector.broadcast %cst_21 : f32 to vector<128x128xf32>
    %27 = arith.maximumf %25, %26 : vector<128x128xf32>
    %28 = arith.truncf %27 : vector<128x128xf32> to vector<128x128xbf16>
    %c0_22 = arith.constant 0 : index
    %c0_23 = arith.constant 0 : index
    %29 = vector.load %arg8[%c0_22, %c0_23] : memref<48x128xbf16, #tpu.memory_space<vmem>>, vector<48x128xbf16>
    %cst_24 = arith.constant dense<0.000000e+00> : vector<48x128xf32>
    %30 = tpu.matmul %29, %28, %cst_24 {dimension_numbers = #tpu.dot_dimension_numbers<[1], [0], [0], [1], [0, 0, 1, 1], [], []>} : vector<48x128xbf16>, vector<128x128xbf16>, vector<48x128xf32> -> vector<48x128xf32>
    %c0_25 = arith.constant 0 : index
    %c0_26 = arith.constant 0 : index
    %31 = vector.load %arg9[%c0_25, %c0_26] : memref<48x1xf32, #tpu.memory_space<vmem>>, vector<48x1xf32>
    %32 = vector.broadcast %31 : vector<48x1xf32> to vector<48x128xf32>
    %33 = arith.addf %30, %32 : vector<48x128xf32>
    %34 = vector.extract_strided_slice %33 {offsets = [0, 0], sizes = [24, 128], strides = [1, 1]} : vector<48x128xf32> to vector<24x128xf32>
    %35 = vector.extract_strided_slice %33 {offsets = [24, 0], sizes = [24, 128], strides = [1, 1]} : vector<48x128xf32> to vector<24x128xf32>
    %cst_27 = arith.constant 2.000000e+01 : f32
    %36 = vector.broadcast %cst_27 : f32 to vector<24x128xf32>
    %37 = arith.cmpf ogt, %35, %36 : vector<24x128xf32>
    %cst_28 = arith.constant 2.000000e+01 : f32
    %38 = vector.broadcast %cst_28 : f32 to vector<24x128xf32>
    %39 = arith.minimumf %35, %38 : vector<24x128xf32>
    %40 = math.exp %39 : vector<24x128xf32>
    %41 = math.log1p %40 : vector<24x128xf32>
    %42 = arith.select %37, %35, %41 : vector<24x128xi1>, vector<24x128xf32>
    %43 = arith.mulf %2, %42 : vector<24x128xf32>
    %44 = arith.addf %34, %43 : vector<24x128xf32>
    %45 = arith.truncf %44 : vector<24x128xf32> to vector<24x128xbf16>
    %c0_29 = arith.constant 0 : index
    %c0_30 = arith.constant 0 : index
    %46 = vector.load %arg10[%c0_29, %c0_30] : memref<128x24xbf16, #tpu.memory_space<vmem>>, vector<128x24xbf16>
    %cst_31 = arith.constant dense<0.000000e+00> : vector<128x128xf32>
    %47 = tpu.matmul %46, %45, %cst_31 {dimension_numbers = #tpu.dot_dimension_numbers<[1], [0], [0], [1], [0, 0, 1, 1], [], []>} : vector<128x24xbf16>, vector<24x128xbf16>, vector<128x128xf32> -> vector<128x128xf32>
    %c0_32 = arith.constant 0 : index
    %c0_33 = arith.constant 0 : index
    %48 = vector.load %arg11[%c0_32, %c0_33] : memref<128x8xbf16, #tpu.memory_space<vmem>>, vector<128x8xbf16>
    %cst_34 = arith.constant dense<0.000000e+00> : vector<128x128xf32>
    %49 = tpu.matmul %48, %1, %cst_34 {dimension_numbers = #tpu.dot_dimension_numbers<[1], [0], [0], [1], [0, 0, 1, 1], [], []>} : vector<128x8xbf16>, vector<8x128xbf16>, vector<128x128xf32> -> vector<128x128xf32>
    %50 = arith.addf %47, %49 : vector<128x128xf32>
    %c0_35 = arith.constant 0 : index
    %c0_36 = arith.constant 0 : index
    %51 = vector.load %arg12[%c0_35, %c0_36] : memref<128x1xf32, #tpu.memory_space<vmem>>, vector<128x1xf32>
    %52 = vector.broadcast %51 : vector<128x1xf32> to vector<128x128xf32>
    %53 = arith.addf %50, %52 : vector<128x128xf32>
    %cst_37 = arith.constant 0.000000e+00 : f32
    %54 = vector.broadcast %cst_37 : f32 to vector<128x128xf32>
    %55 = arith.maximumf %53, %54 : vector<128x128xf32>
    %56 = arith.truncf %55 : vector<128x128xf32> to vector<128x128xbf16>
    %c0_38 = arith.constant 0 : index
    %c0_39 = arith.constant 0 : index
    %57 = vector.load %arg13[%c0_38, %c0_39] : memref<256x128xbf16, #tpu.memory_space<vmem>>, vector<256x128xbf16>
    %cst_40 = arith.constant dense<0.000000e+00> : vector<256x128xf32>
    %58 = tpu.matmul %57, %56, %cst_40 {dimension_numbers = #tpu.dot_dimension_numbers<[1], [0], [0], [1], [0, 0, 1, 1], [], []>} : vector<256x128xbf16>, vector<128x128xbf16>, vector<256x128xf32> -> vector<256x128xf32>
    %c0_41 = arith.constant 0 : index
    %c0_42 = arith.constant 0 : index
    %59 = vector.load %arg14[%c0_41, %c0_42] : memref<256x1xf32, #tpu.memory_space<vmem>>, vector<256x1xf32>
    %60 = vector.broadcast %59 : vector<256x1xf32> to vector<256x128xf32>
    %61 = arith.addf %58, %60 : vector<256x128xf32>
    %cst_43 = arith.constant 0.000000e+00 : f32
    %62 = vector.broadcast %cst_43 : f32 to vector<256x128xf32>
    %63 = arith.maximumf %61, %62 : vector<256x128xf32>
    %64 = arith.truncf %63 : vector<256x128xf32> to vector<256x128xbf16>
    %c0_44 = arith.constant 0 : index
    %c0_45 = arith.constant 0 : index
    %65 = vector.load %arg15[%c0_44, %c0_45] : memref<128x256xbf16, #tpu.memory_space<vmem>>, vector<128x256xbf16>
    %cst_46 = arith.constant dense<0.000000e+00> : vector<128x128xf32>
    %66 = tpu.matmul %65, %64, %cst_46 {dimension_numbers = #tpu.dot_dimension_numbers<[1], [0], [0], [1], [0, 0, 1, 1], [], []>} : vector<128x256xbf16>, vector<256x128xbf16>, vector<128x128xf32> -> vector<128x128xf32>
    %c0_47 = arith.constant 0 : index
    %c0_48 = arith.constant 0 : index
    %67 = vector.load %arg16[%c0_47, %c0_48] : memref<128x1xf32, #tpu.memory_space<vmem>>, vector<128x1xf32>
    %68 = vector.broadcast %67 : vector<128x1xf32> to vector<128x128xf32>
    %69 = arith.addf %66, %68 : vector<128x128xf32>
    %cst_49 = arith.constant 0.000000e+00 : f32
    %70 = vector.broadcast %cst_49 : f32 to vector<128x128xf32>
    %71 = arith.maximumf %69, %70 : vector<128x128xf32>
    %72 = arith.truncf %71 : vector<128x128xf32> to vector<128x128xbf16>
    %c0_50 = arith.constant 0 : index
    %c0_51 = arith.constant 0 : index
    %73 = vector.load %arg17[%c0_50, %c0_51] : memref<8x128xbf16, #tpu.memory_space<vmem>>, vector<8x128xbf16>
    %cst_52 = arith.constant dense<0.000000e+00> : vector<8x128xf32>
    %74 = tpu.matmul %73, %72, %cst_52 {dimension_numbers = #tpu.dot_dimension_numbers<[1], [0], [0], [1], [0, 0, 1, 1], [], []>} : vector<8x128xbf16>, vector<128x128xbf16>, vector<8x128xf32> -> vector<8x128xf32>
    %75 = vector.extract_strided_slice %74 {offsets = [0, 0], sizes = [1, 128], strides = [1, 1]} : vector<8x128xf32> to vector<1x128xf32>
    %c0_53 = arith.constant 0 : index
    %c0_54 = arith.constant 0 : index
    %76 = vector.load %arg18[%c0_53, %c0_54] : memref<2x1xf32, #tpu.memory_space<vmem>>, vector<1x1xf32>
    %77 = vector.broadcast %76 : vector<1x1xf32> to vector<1x128xf32>
    %78 = arith.addf %75, %77 : vector<1x128xf32>
    %79 = vector.extract_strided_slice %74 {offsets = [1, 0], sizes = [1, 128], strides = [1, 1]} : vector<8x128xf32> to vector<1x128xf32>
    %c1_55 = arith.constant 1 : index
    %c0_56 = arith.constant 0 : index
    %80 = vector.load %arg18[%c1_55, %c0_56] : memref<2x1xf32, #tpu.memory_space<vmem>>, vector<1x1xf32>
    %81 = vector.broadcast %80 : vector<1x1xf32> to vector<1x128xf32>
    %82 = arith.addf %79, %81 : vector<1x128xf32>
    %83 = arith.subf %3, %78 : vector<1x128xf32>
    %cst_57 = arith.constant 1.250000e+01 : f32
    %84 = vector.broadcast %cst_57 : f32 to vector<1x128xf32>
    %85 = arith.mulf %83, %84 : vector<1x128xf32>
    %86 = arith.subf %4, %82 : vector<1x128xf32>
    %cst_58 = arith.constant 1.250000e+01 : f32
    %87 = vector.broadcast %cst_58 : f32 to vector<1x128xf32>
    %88 = arith.mulf %86, %87 : vector<1x128xf32>
    %89 = arith.mulf %85, %85 : vector<1x128xf32>
    %90 = arith.mulf %88, %88 : vector<1x128xf32>
    %91 = arith.addf %89, %90 : vector<1x128xf32>
    %cst_59 = arith.constant -5.000000e-01 : f32
    %92 = vector.broadcast %cst_59 : f32 to vector<1x128xf32>
    %93 = arith.mulf %92, %91 : vector<1x128xf32>
    %cst_60 = arith.constant -3.21358013 : f32
    %94 = vector.broadcast %cst_60 : f32 to vector<1x128xf32>
    %95 = arith.subf %93, %94 : vector<1x128xf32>
    %96 = tpu.iota {dimensions = array<i32: 0>} : vector<24x1xi32>
    %97 = math.log %42 : vector<24x128xf32>
    %cst_61 = arith.constant 0.000000e+00 : f32
    %98 = vector.broadcast %cst_61 : f32 to vector<24x128xf32>
    %99 = arith.subf %98, %97 : vector<24x128xf32>
    %100 = arith.mulf %42, %42 : vector<24x128xf32>
    %101 = arith.mulf %34, %34 : vector<24x128xf32>
    %102 = arith.addf %100, %101 : vector<24x128xf32>
    %cst_62 = arith.constant 5.000000e-01 : f32
    %103 = vector.broadcast %cst_62 : f32 to vector<24x128xf32>
    %104 = arith.mulf %103, %102 : vector<24x128xf32>
    %105 = arith.addf %99, %104 : vector<24x128xf32>
    %cst_63 = arith.constant 5.000000e-01 : f32
    %106 = vector.broadcast %cst_63 : f32 to vector<24x128xf32>
    %107 = arith.subf %105, %106 : vector<24x128xf32>
    %c20_i32 = arith.constant 20 : i32
    %108 = vector.broadcast %c20_i32 : i32 to vector<24x1xi32>
    %109 = arith.cmpi slt, %96, %108 : vector<24x1xi32>
    %cst_64 = arith.constant 0.000000e+00 : f32
    %110 = vector.shape_cast %109 : vector<24x1xi1> to vector<24x1xi1>
    %111 = vector.broadcast %110 : vector<24x1xi1> to vector<24x128xi1>
    %112 = vector.broadcast %cst_64 : f32 to vector<24x128xf32>
    %113 = arith.select %111, %107, %112 : vector<24x128xi1>, vector<24x128xf32>
    %cst_65 = arith.constant dense<0.000000e+00> : vector<128xf32>
    %114 = vector.multi_reduction <add>, %113, %cst_65 [0] : vector<24x128xf32> to vector<128xf32>
    %115 = vector.shape_cast %114 : vector<128xf32> to vector<1x128xf32>
    %116 = arith.subf %95, %115 : vector<1x128xf32>
    %c0_66 = arith.constant 0 : index
    %c0_67 = arith.constant 0 : index
    %117 = vector.load %arg19[%c0_66, %c0_67] : memref<1x128xf32, #tpu.memory_space<vmem>>, vector<1x128xf32>
    tpu.vector_store %arg19[%c0_66, %c0_67], %116 {strides = array<i32>} : memref<1x128xf32, #tpu.memory_space<vmem>>, vector<1x128xf32>,
    return
  }
  func.func @transform_0(%arg0: i32) -> (i32, i32) {
    %c0_i32 = arith.constant 0 : i32
    %c0_i32_0 = arith.constant 0 : i32
    return %c0_i32, %arg0 : i32, i32
  }
  func.func @transform_1(%arg0: i32) -> (i32, i32) {
    %c0_i32 = arith.constant 0 : i32
    %c0_i32_0 = arith.constant 0 : i32
    %c0_i32_1 = arith.constant 0 : i32
    return %c0_i32, %c0_i32_0 : i32, i32
  }
  func.func @transform_2(%arg0: i32) -> (i32, i32) {
    %c0_i32 = arith.constant 0 : i32
    %c0_i32_0 = arith.constant 0 : i32
    %c0_i32_1 = arith.constant 0 : i32
    return %c0_i32, %c0_i32_0 : i32, i32
  }
  func.func @transform_3(%arg0: i32) -> (i32, i32) {
    %c0_i32 = arith.constant 0 : i32
    %c0_i32_0 = arith.constant 0 : i32
    %c0_i32_1 = arith.constant 0 : i32
    return %c0_i32, %c0_i32_0 : i32, i32
  }
  func.func @transform_4(%arg0: i32) -> (i32, i32) {
    %c0_i32 = arith.constant 0 : i32
    %c0_i32_0 = arith.constant 0 : i32
    %c0_i32_1 = arith.constant 0 : i32
    return %c0_i32, %c0_i32_0 : i32, i32
  }
  func.func @transform_5(%arg0: i32) -> (i32, i32) {
    %c0_i32 = arith.constant 0 : i32
    %c0_i32_0 = arith.constant 0 : i32
    %c0_i32_1 = arith.constant 0 : i32
    return %c0_i32, %c0_i32_0 : i32, i32
  }
  func.func @transform_6(%arg0: i32) -> (i32, i32) {
    %c0_i32 = arith.constant 0 : i32
    %c0_i32_0 = arith.constant 0 : i32
    %c0_i32_1 = arith.constant 0 : i32
    return %c0_i32, %c0_i32_0 : i32, i32
  }
  func.func @transform_7(%arg0: i32) -> (i32, i32) {
    %c0_i32 = arith.constant 0 : i32
    %c0_i32_0 = arith.constant 0 : i32
    %c0_i32_1 = arith.constant 0 : i32
    return %c0_i32, %c0_i32_0 : i32, i32
  }
  func.func @transform_8(%arg0: i32) -> (i32, i32) {
    %c0_i32 = arith.constant 0 : i32
    %c0_i32_0 = arith.constant 0 : i32
    %c0_i32_1 = arith.constant 0 : i32
    return %c0_i32, %c0_i32_0 : i32, i32
  }
  func.func @transform_9(%arg0: i32) -> (i32, i32) {
    %c0_i32 = arith.constant 0 : i32
    %c0_i32_0 = arith.constant 0 : i32
    %c0_i32_1 = arith.constant 0 : i32
    return %c0_i32, %c0_i32_0 : i32, i32
  }
  func.func @transform_10(%arg0: i32) -> (i32, i32) {
    %c0_i32 = arith.constant 0 : i32
    %c0_i32_0 = arith.constant 0 : i32
    %c0_i32_1 = arith.constant 0 : i32
    return %c0_i32, %c0_i32_0 : i32, i32
  }
  func.func @transform_11(%arg0: i32) -> (i32, i32) {
    %c0_i32 = arith.constant 0 : i32
    %c0_i32_0 = arith.constant 0 : i32
    %c0_i32_1 = arith.constant 0 : i32
    return %c0_i32, %c0_i32_0 : i32, i32
  }
  func.func @transform_12(%arg0: i32) -> (i32, i32) {
    %c0_i32 = arith.constant 0 : i32
    %c0_i32_0 = arith.constant 0 : i32
    %c0_i32_1 = arith.constant 0 : i32
    return %c0_i32, %c0_i32_0 : i32, i32
  }
  func.func @transform_13(%arg0: i32) -> (i32, i32) {
    %c0_i32 = arith.constant 0 : i32
    %c0_i32_0 = arith.constant 0 : i32
    %c0_i32_1 = arith.constant 0 : i32
    return %c0_i32, %c0_i32_0 : i32, i32
  }
  func.func @transform_14(%arg0: i32) -> (i32, i32) {
    %c0_i32 = arith.constant 0 : i32
    %c0_i32_0 = arith.constant 0 : i32
    %c0_i32_1 = arith.constant 0 : i32
    return %c0_i32, %c0_i32_0 : i32, i32
  }
  func.func @transform_15(%arg0: i32) -> (i32, i32) {
    %c0_i32 = arith.constant 0 : i32
    %c0_i32_0 = arith.constant 0 : i32
    %c0_i32_1 = arith.constant 0 : i32
    return %c0_i32, %c0_i32_0 : i32, i32
  }
  func.func @transform_16(%arg0: i32) -> (i32, i32) {
    %c0_i32 = arith.constant 0 : i32
    %c0_i32_0 = arith.constant 0 : i32
    %c0_i32_1 = arith.constant 0 : i32
    return %c0_i32, %c0_i32_0 : i32, i32
  }
  func.func @transform_17(%arg0: i32) -> (i32, i32) {
    %c0_i32 = arith.constant 0 : i32
    %c0_i32_0 = arith.constant 0 : i32
    %c0_i32_1 = arith.constant 0 : i32
    return %c0_i32, %c0_i32_0 : i32, i32
  }
  func.func @transform_18(%arg0: i32) -> (i32, i32) {
    %c0_i32 = arith.constant 0 : i32
    %c0_i32_0 = arith.constant 0 : i32
    return %c0_i32, %arg0 : i32, i32
  }
}

</mosaic_0001>

<bundles_post_ra>
// kernel: cvae_halfmoon_forward.1
= control target key start
LH: loop header
LB: loop body
LE: loop exit
PB: predicated region body
PF: predicated region fallthrough
CT: control target
= control target key end

     0   :  { %s5496_s0 = inlined_call_operand.vmem [shape: f32[32,256], index: 0, kind: input, shape index: {}]   ;;  %s5497_s1 = inlined_call_operand.vmem [shape: bf16[128,8], index: 1, kind: input, shape index: {}]   ;;  %s5498_s2 = inlined_call_operand.vmem [shape: f32[128,1], index: 2, kind: input, shape index: {}]   ;;  %s5499_s3 = inlined_call_operand.vmem [shape: bf16[256,128], index: 3, kind: input, shape index: {}]   ;;  %s5500_s4 = inlined_call_operand.vmem [shape: f32[256,1], index: 4, kind: input, shape index: {}]   ;;  %s5501_s5 = inlined_call_operand.vmem [shape: bf16[128,256], index: 5, kind: input, shape index: {}]   ;;  %s5502_s6 = inlined_call_operand.vmem [shape: f32[128,1], index: 6, kind: input, shape index: {}]   ;;  %s5503_s7 = inlined_call_operand.vmem [shape: bf16[48,128], index: 7, kind: input, shape index: {}]   ;;  %s5504_s8 = inlined_call_operand.vmem [shape: f32[48,1], index: 8, kind: input, shape index: {}]   ;;  %s5505_s9 = inlined_call_operand.vmem [shape: bf16[128,24], index: 9, kind: input, shape index: {}]   ;;  %s5506_s10 = inlined_call_operand.vmem [shape: bf16[128,8], index: 10, kind: input, shape index: {}]   ;;  %s5507_s11 = inlined_call_operand.vmem [shape: f32[128,1], index: 11, kind: input, shape index: {}]   ;;  %s5508_s12 = inlined_call_operand.vmem [shape: bf16[256,128], index: 12, kind: input, shape index: {}]   ;;  %s5509_s13 = inlined_call_operand.vmem [shape: f32[256,1], index: 13, kind: input, shape index: {}]   ;;  %s5510_s14 = inlined_call_operand.vmem [shape: bf16[128,256], index: 14, kind: input, shape index: {}]   ;;  %s5511_s15 = inlined_call_operand.vmem [shape: f32[128,1], index: 15, kind: input, shape index: {}]   ;;  %s5512_s16 = inlined_call_operand.vmem [shape: bf16[8,128], index: 16, kind: input, shape index: {}]   ;;  %s5513_s17 = inlined_call_operand.vmem [shape: f32[2,1], index: 17, kind: input, shape index: {}]   ;;  %s5514_s18 = inlined_call_operand.vmem [shape: f32[1,256], index: 18, kind: output, shape index: {}]  }
   0x1   :  { %5520 = sst [smem:[#allocation6_spill]] %s5496_s0 }
   0x2   :  { %5521 = sst [smem:[#allocation7_spill]] %s5497_s1 }
   0x3   :  { %5522 = sst [smem:[#allocation8_spill]] %s5498_s2 }
   0x4   :  { %s4280_s27 = smov 0   ;;  %s4282_s28 = smov 0  }
   0x5   :  { %s4284_s29 = smov 0  }
   0x6 LB: > { %5523 = sst [smem:[#allocation3_spill]] %s4176_s28  ;;  %s4297_s0 = sadd.s32 1, %s4180_s29   ;;  %s4180_s29 = sphi %s4284_s29, %s5532_s29   ;;  %s4176_s28 = sphi %s4282_s28, %s5534_s28   ;;  %s4172_s27 = sphi %s4280_s27, %s5533_s27  }
   0x7   : > { %5524 = sst [smem:[#allocation4_spill]] %s4297_s0  ;;  %s32_s19 = ssub.s32 %s4180_s29, %s4297_s0 }
   0x8   : > { %s35_s1 = sadd.s32 1, %s4176_s28  ;;  %p33_p0 = scmp.eq.s32.totalorder %s32_s19, 0 }
   0x9   : > { %p42_p1 = scmp.ne.s32.totalorder %s4176_s28, %s4172_s27  ;;  %p43_p2 = scmp.eq.s32.totalorder %s4180_s29, 0 }
   0xa   : > { %s4306_s20 = scalar_select %p33_p0, %s4176_s28, %s35_s1  }
   0xb   : > { %p44_p3 = por %p43_p2, %p42_p1  ;;  %p3451_p4 = scmp.ge.s32.totalorder %s4180_s29, 2 }
   0xc   : > { %5525 = sst [smem:[#allocation5_spill]] %s4306_s20 }
   0xd   : > { %502 = sbr.rel (%p3451_p4) target bundleno = 30 (0x1e), region = 84 }
  0x12   : > { %505 = sbr.rel (!%p44_p3) target bundleno = 30 (0x1e), region = 88  ;;  %s507_s21 = sand.u32 (%p44_p3), 1, %s4176_s28  }
  0x13   : > { %s3453_s22 = sshll.u32 (%p44_p3), %s4180_s29, 3  ;;  %s3452_s2 = sshll.u32 (%p44_p3), %s507_s21, 5 }
  0x14   : > { %s5526_s25 = sld [smem:[#allocation6_spill]] (%p44_p3)  ;;  %s509_s19 = scalar_lea.vmem (%p44_p3), [#allocation2], %s3452_s2 }
  0x1a   : > { %s511_s26 = scalar_lea.vmem %s5526_s25, %s3453_s22 }
  0x1b   : > { %v546_v0 = vld [vmem:[%s511_s26] sm:$0xff]  ;;  %v548_v1 = vld [vmem:[%s511_s26 + $0x10] sm:$0xff] }
  0x1c   : > { %v550_v2 = vld [vmem:[%s511_s26 + $0x20] sm:$0xff]  ;;  %547 = vst [vmem:[%s509_s19] sm:$0xff] %v546_v0  ;;  %549 = vst [vmem:[%s509_s19 + $0x8] sm:$0xff] %v548_v1  ;;  %v552_v3 = vld [vmem:[%s511_s26 + $0x30] sm:$0xff] }
  0x1d   : > { %551 = vst [vmem:[%s509_s19 + $0x10] sm:$0xff] %v550_v2  ;;  %553 = vst [vmem:[%s509_s19 + $0x18] sm:$0xff] %v552_v3 }
  0x1e PF: > { %p3454_p5 = scmp.ge.s32.totalorder %s4180_s29, 1  ;;  %p558_p6 = scmp.lt.s32.totalorder %s4180_s29, 3 }
  0x20   : > { %p559_p7 = pnand %p3454_p5, %p558_p6 }
  0x21   : > { %s5527_s22 = sld [smem:[#allocation8_spill]] (!%p559_p7)  ;;  %s565_s24 = sand.u32 (!%p559_p7), 1, %s4172_s27  }
  0x22   : > { %562 = sbr.rel (%p559_p7) target bundleno = 2216 (0x8a8), region = 126  ;;  %s3455_s25 = sshll.u32 (!%p559_p7), %s565_s24, 5 }
  0x23   : > { %s5528_s28 = sld [smem:[#allocation7_spill]] (!%p559_p7)  ;;  %s4332_s27 = scalar_lea.vmem (!%p559_p7), [#allocation2], %s3455_s25 }
  0x24   : > { %s5530_s25 = sadd.s32 (!%p559_p7), 4294967295, %s4180_s29  }
  0x25   : > { %p616_p8 = scmp.lt.s32.totalorder (!%p559_p7), %s5530_s25, 1  ;;  %s5531_s26 = smov (!%p559_p7), %s5530_s25 }
  0x27   : > { %v657_v4 = vld [vmem:[%s5527_s22 + $0x70] sm:$0xff]  ;;  %v655_v5 = vld [vmem:[%s5527_s22 + $0x60] sm:$0xff]  ;;  %v4182_v6 = vmov 0   ;;  %v658_v7 = vld [vmem:[%s5527_s22 + $0x78] sm:$0xff]  ;;  %vm779_vm0 = vcmask 64512   ;;  %vm804_vm1 = vcmask 1043456  }
  0x28   : > { %4032 = vset.pattern.permute.xlu1 %v4182_v6  ;;  %4031 = vset.pattern.permute.xlu0 %v4182_v6  ;;  %v656_v8 = vld [vmem:[%s5527_s22 + $0x68] sm:$0xff]  ;;  %v620_v10 = vld [vmem:[%s4332_s27] sm:$0xff]  ;;  %v654_v13 = vld [vmem:[%s5527_s22 + $0x58] sm:$0xff]  ;;  %vm4184_vm2 = vmmov 0   ;;  %vm2171_vm3 = vcmask 195584   ;;  %s5536_s26 = smov (!%p616_p8, %s5531_s26), 1 }
  0x29   : > { %731 = vperm.xlu0 %4031, %v657_v4   ;;  %721 = vperm.xlu1 %4032, %v655_v5   ;;  %s5529_s0 = smov %s5528_s28  ;;  %v4033_v9 = vld [vmem:[%s5528_s28] sm:$0xff]   ;;  %v4335_v11 = vpack.c.bf16 %v620_v10, %v620_v10  ;;  %v653_v14 = vld [vmem:[%s5527_s22 + $0x50] sm:$0xff]  ;;  %v652_v17 = vld [vmem:[%s5527_s22 + $0x48] sm:$0xff]  ;;  %s618_s1 = scalar_lea.vmem %s5514_s18, %s5536_s26 }
  0x2a   : > { %3803 = vmatprep.mubr.msk.bf16.mxu0 %vm779_vm0, %v4033_v9  ;;  %v4034_v15 = vld [vmem:[%s5529_s0 + $0x8] sm:$0xff]   ;;  %v4035_v16 = vld [vmem:[%s5529_s0 + $0x10] sm:$0xff]   ;;  %v651_v18 = vld [vmem:[%s5527_s22 + $0x40] sm:$0xff] }
  0x2b   : > { %v4340_v12 = vsel %vm804_vm1, %v4335_v11, 0  ;;  %4001 = vmatprep.subr.msk.bf16.mxu0 %vm804_vm1, %v4335_v11  ;;  %v650_v19 = vld [vmem:[%s5527_s22 + $0x38] sm:$0xff]  ;;  %v649_v20 = vld [vmem:[%s5527_s22 + $0x30] sm:$0xff]  ;;  %v4037_v22 = vld [vmem:[%s5529_s0 + $0x20] sm:$0xff]  }
  0x2c   : > { %3802 = vmatpush3.bf16.msra.mxu0 %v4340_v12  ;;  %v4036_v21 = vld [vmem:[%s5529_s0 + $0x18] sm:$0xff]   ;;  %v648_v23 = vld [vmem:[%s5527_s22 + $0x28] sm:$0xff]  ;;  %v647_v24 = vld [vmem:[%s5527_s22 + $0x20] sm:$0xff] }
  0x2d   : > { %736 = vperm.xlu0 %4031, %v658_v7   ;;  %726 = vperm.xlu1 %4032, %v656_v8   ;;  %v646_v25 = vld [vmem:[%s5527_s22 + $0x18] sm:$0xff]  ;;  %v645_v26 = vld [vmem:[%s5527_s22 + $0x10] sm:$0xff]  ;;  %v4038_v27 = vld [vmem:[%s5529_s0 + $0x28] sm:$0xff]  }
  0x2e   : > { %v4039_v28 = vld [vmem:[%s5529_s0 + $0x30] sm:$0xff]   ;;  %v644_v29 = vld [vmem:[%s5527_s22 + $0x8] sm:$0xff]  ;;  %v643_v30 = vld [vmem:[%s5527_s22] sm:$0xff] }
  0x2f   : > { %3804 = vmatmul.mubr.msk.bf16.vlgmr.msra.gmra.mxu0 %vm779_vm0, %v4034_v15  ;;  %v992_v31 = vld [vmem:[%s5500_s4 + $0xf8] sm:$0xff]  ;;  %v991_v32 = vld [vmem:[%s5500_s4 + $0xf0] sm:$0xff]  ;;  %v990_v36 = vld [vmem:[%s5500_s4 + $0xe8] sm:$0xff] }
  0x30   : > { %3807 = vmatprep.mubr.msk.bf16.mxu0 %vm779_vm0, %v4035_v16  ;;  %v4040_v33 = vld [vmem:[%s5529_s0 + $0x38] sm:$0xff]   ;;  %v975_v35 = vld [vmem:[%s5500_s4 + $0x70] sm:$0xff]  ;;  %v989_v37 = vld [vmem:[%s5500_s4 + $0xe0] sm:$0xff] }
  0x31   : > { %716 = vperm.xlu1 %4032, %v654_v13   ;;  %711 = vperm.xlu0 %4031, %v653_v14   ;;  %v976_v34 = vld [vmem:[%s5500_s4 + $0x78] sm:$0xff]  ;;  %v974_v38 = vld [vmem:[%s5500_s4 + $0x68] sm:$0xff]  ;;  %v973_v39 = vld [vmem:[%s5500_s4 + $0x60] sm:$0xff] }
  0x32   : > { %v988_v40 = vld [vmem:[%s5500_s4 + $0xd8] sm:$0xff]  ;;  %v987_v41 = vld [vmem:[%s5500_s4 + $0xd0] sm:$0xff]  ;;  %v986_v44 = vld [vmem:[%s5500_s4 + $0xc8] sm:$0xff] }
  0x33   : > { %v972_v42 = vld [vmem:[%s5500_s4 + $0x58] sm:$0xff]  ;;  %v971_v43 = vld [vmem:[%s5500_s4 + $0x50] sm:$0xff]  ;;  %v985_v45 = vld [vmem:[%s5500_s4 + $0xc0] sm:$0xff] }
  0x34   : > { %v970_v46 = vld [vmem:[%s5500_s4 + $0x48] sm:$0xff]  ;;  %v969_v47 = vld [vmem:[%s5500_s4 + $0x40] sm:$0xff]  ;;  %v984_v48 = vld [vmem:[%s5500_s4 + $0xb8] sm:$0xff] }
  0x35   : > { %706 = vperm.xlu1 %4032, %v652_v17   ;;  %701 = vperm.xlu0 %4031, %v651_v18   ;;  %v983_v49 = vld [vmem:[%s5500_s4 + $0xb0] sm:$0xff]  ;;  %v968_v50 = vld [vmem:[%s5500_s4 + $0x38] sm:$0xff]  ;;  %v982_v52 = vld [vmem:[%s5500_s4 + $0xa8] sm:$0xff] }
  0x36   : > { %v967_v51 = vld [vmem:[%s5500_s4 + $0x30] sm:$0xff]  ;;  %v981_v53 = vld [vmem:[%s5500_s4 + $0xa0] sm:$0xff]  ;;  %v966_v54 = vld [vmem:[%s5500_s4 + $0x28] sm:$0xff] }
  0x37   : > { %3808 = vmatmul.mubr.msk.bf16.gmra.mxu0 %vm779_vm0, %v4036_v21  ;;  %v965_v55 = vld [vmem:[%s5500_s4 + $0x20] sm:$0xff]  ;;  %v980_v56 = vld [vmem:[%s5500_s4 + $0x98] sm:$0xff]  ;;  %v979_v57 = vld [vmem:[%s5500_s4 + $0x90] sm:$0xff] }
  0x38   : > { %3811 = vmatprep.mubr.msk.bf16.mxu0 %vm779_vm0, %v4037_v22  ;;  %v964_v58 = vld [vmem:[%s5500_s4 + $0x18] sm:$0xff]  ;;  %v963_v59 = vld [vmem:[%s5500_s4 + $0x10] sm:$0xff]  ;;  %v978_v60 = vld [vmem:[%s5500_s4 + $0x88] sm:$0xff] }
  0x39   : > { %696 = vperm.xlu1 %4032, %v650_v19   ;;  %691 = vperm.xlu0 %4031, %v649_v20   ;;  %v977_v61 = vld [vmem:[%s5500_s4 + $0x80] sm:$0xff]  ;;  %v962_v62 = vld [vmem:[%s5500_s4 + $0x8] sm:$0xff]  ;;  %v1489_v0 = vld [vmem:[%s5502_s6 + $0x78] sm:$0xff] }
  0x3a   : > { %v961_v63 = vld [vmem:[%s5500_s4] sm:$0xff]  ;;  %v1488_v1 = vld [vmem:[%s5502_s6 + $0x70] sm:$0xff]  ;;  %v1487_v2 = vld [vmem:[%s5502_s6 + $0x68] sm:$0xff] }
  0x3b   : > { %v1486_v3 = vld [vmem:[%s5502_s6 + $0x60] sm:$0xff]  ;;  %v1485_v4 = vld [vmem:[%s5502_s6 + $0x58] sm:$0xff]  ;;  %v1484_v5 = vld [vmem:[%s5502_s6 + $0x50] sm:$0xff] }
  0x3c   : > { %v1483_v6 = vld [vmem:[%s5502_s6 + $0x48] sm:$0xff]  ;;  %v1482_v7 = vld [vmem:[%s5502_s6 + $0x40] sm:$0xff]  ;;  %v1481_v8 = vld [vmem:[%s5502_s6 + $0x38] sm:$0xff] }
  0x3d   : > { %686 = vperm.xlu1 %4032, %v648_v23   ;;  %681 = vperm.xlu0 %4031, %v647_v24   ;;  %v1480_v9 = vld [vmem:[%s5502_s6 + $0x30] sm:$0xff]  ;;  %v1479_v10 = vld [vmem:[%s5502_s6 + $0x28] sm:$0xff]  ;;  %v1478_v13 = vld [vmem:[%s5502_s6 + $0x20] sm:$0xff] }
  0x3e   : > { %v1477_v14 = vld [vmem:[%s5502_s6 + $0x18] sm:$0xff]  ;;  %v1476_v15 = vld [vmem:[%s5502_s6 + $0x10] sm:$0xff]  ;;  %v1475_v16 = vld [vmem:[%s5502_s6 + $0x8] sm:$0xff] }
  0x3f   : > { %3812 = vmatmul.mubr.msk.bf16.gmra.mxu0 %vm779_vm0, %v4038_v27  ;;  %v1474_v17 = vld [vmem:[%s5502_s6] sm:$0xff]  ;;  %v1780_v18 = vld [vmem:[%s5504_s8 + $0x18] sm:$0xff]  ;;  %v1782_v19 = vld [vmem:[%s5504_s8 + $0x28] sm:$0xff] }
  0x40   : > { %3815 = vmatprep.mubr.msk.bf16.mxu0 %vm779_vm0, %v4039_v28  ;;  %v1779_v20 = vld [vmem:[%s5504_s8 + $0x10] sm:$0xff]  ;;  %v1781_v21 = vld [vmem:[%s5504_s8 + $0x20] sm:$0xff]  ;;  %v1778_v22 = vld [vmem:[%s5504_s8 + $0x8] sm:$0xff] }
  0x41   : > { %676 = vperm.xlu1 %4032, %v646_v25   ;;  %671 = vperm.xlu0 %4031, %v645_v26   ;;  %v1777_v23 = vld [vmem:[%s5504_s8] sm:$0xff]  ;;  %v2311_v24 = vld [vmem:[%s5507_s11 + $0x78] sm:$0xff]  ;;  %v2310_v25 = vld [vmem:[%s5507_s11 + $0x70] sm:$0xff] }
  0x42   : > { %v4041_v26 = vld [vmem:[%s5499_s3] sm:$0xff]   ;;  %v2309_v27 = vld [vmem:[%s5507_s11 + $0x68] sm:$0xff] }
  0x43   : > { %3835 = vmatprep.mubr.bf16.mxu1 %v4041_v26  ;;  %v2308_v28 = vld [vmem:[%s5507_s11 + $0x60] sm:$0xff]  ;;  %v2469_v26 = vld [vmem:[%s5509_s13 + $0x28] sm:$0xff] }
  0x45   : > { %666 = vperm.xlu1 %4032, %v644_v29   ;;  %661 = vperm.xlu0 %4031, %v643_v30   ;;  %v2307_v29 = vld [vmem:[%s5507_s11 + $0x58] sm:$0xff]  ;;  %v2306_v30 = vld [vmem:[%s5507_s11 + $0x50] sm:$0xff] }
  0x47   : > { %3816 = vmatmul.mubr.msk.bf16.gmra.mxu0 %vm779_vm0, %v4040_v33  ;;  %v2303_v33 = vld [vmem:[%s5507_s11 + $0x38] sm:$0xff] }
  0x49   : > { %1150 = vperm.xlu1 %4032, %v992_v31   ;;  %1145 = vperm.xlu0 %4031, %v991_v32   ;;  %v2305_v31 = vld [vmem:[%s5507_s11 + $0x48] sm:$0xff]  ;;  %v2304_v32 = vld [vmem:[%s5507_s11 + $0x40] sm:$0xff] }
  0x4d   : > { %1070 = vperm.xlu1 %4032, %v976_v34   ;;  %1065 = vperm.xlu0 %4031, %v975_v35   ;;  %v2302_v34 = vld [vmem:[%s5507_s11 + $0x30] sm:$0xff]  ;;  %v2301_v35 = vld [vmem:[%s5507_s11 + $0x28] sm:$0xff] }
  0x51   : > { %1140 = vperm.xlu1 %4032, %v990_v36   ;;  %1135 = vperm.xlu0 %4031, %v989_v37   ;;  %v2300_v36 = vld [vmem:[%s5507_s11 + $0x20] sm:$0xff] }
  0x55   : > { %1060 = vperm.xlu1 %4032, %v974_v38   ;;  %1055 = vperm.xlu0 %4031, %v973_v39   ;;  %v2299_v39 = vld [vmem:[%s5507_s11 + $0x18] sm:$0xff] }
  0x59   : > { %1130 = vperm.xlu1 %4032, %v988_v40   ;;  %1125 = vperm.xlu0 %4031, %v987_v41   ;;  %v2298_v40 = vld [vmem:[%s5507_s11 + $0x10] sm:$0xff]  ;;  %v2297_v41 = vld [vmem:[%s5507_s11 + $0x8] sm:$0xff] }
  0x5d   : > { %1050 = vperm.xlu1 %4032, %v972_v42   ;;  %1045 = vperm.xlu0 %4031, %v971_v43   ;;  %v2296_v42 = vld [vmem:[%s5507_s11] sm:$0xff] }
  0x61   : > { %1120 = vperm.xlu1 %4032, %v986_v44   ;;  %1115 = vperm.xlu0 %4031, %v985_v45   ;;  %v2495_v45 = vld [vmem:[%s5509_s13 + $0xf8] sm:$0xff] }
  0x65   : > { %1040 = vperm.xlu1 %4032, %v970_v46   ;;  %1035 = vperm.xlu0 %4031, %v969_v47   ;;  %v2494_v46 = vld [vmem:[%s5509_s13 + $0xf0] sm:$0xff] }
  0x69   : > { %1110 = vperm.xlu1 %4032, %v984_v48   ;;  %1105 = vperm.xlu0 %4031, %v983_v49   ;;  %v2479_v49 = vld [vmem:[%s5509_s13 + $0x78] sm:$0xff] }
  0x6d   : > { %1030 = vperm.xlu1 %4032, %v968_v50   ;;  %1025 = vperm.xlu0 %4031, %v967_v51   ;;  %v2478_v50 = vld [vmem:[%s5509_s13 + $0x70] sm:$0xff]  ;;  %v2493_v51 = vld [vmem:[%s5509_s13 + $0xe8] sm:$0xff] }
  0x71   : > { %1100 = vperm.xlu1 %4032, %v982_v52   ;;  %1095 = vperm.xlu0 %4031, %v981_v53   ;;  %v2492_v52 = vld [vmem:[%s5509_s13 + $0xe0] sm:$0xff] }
  0x75   : > { %1020 = vperm.xlu1 %4032, %v966_v54   ;;  %1015 = vperm.xlu0 %4031, %v965_v55   ;;  %v2477_v55 = vld [vmem:[%s5509_s13 + $0x68] sm:$0xff] }
  0x79   : > { %1090 = vperm.xlu1 %4032, %v980_v56   ;;  %1085 = vperm.xlu0 %4031, %v979_v57   ;;  %v2476_v56 = vld [vmem:[%s5509_s13 + $0x60] sm:$0xff] }
  0x7d   : > { %1010 = vperm.xlu1 %4032, %v964_v58   ;;  %1005 = vperm.xlu0 %4031, %v963_v59   ;;  %v2491_v59 = vld [vmem:[%s5509_s13 + $0xd8] sm:$0xff] }
  0x81   : > { %1080 = vperm.xlu1 %4032, %v978_v60   ;;  %1075 = vperm.xlu0 %4031, %v977_v61   ;;  %v2490_v60 = vld [vmem:[%s5509_s13 + $0xd0] sm:$0xff]  ;;  %v2475_v61 = vld [vmem:[%s5509_s13 + $0x58] sm:$0xff] }
  0x85   : > { %1000 = vperm.xlu1 %4032, %v962_v62   ;;  %995 = vperm.xlu0 %4031, %v961_v63   ;;  %v2474_v62 = vld [vmem:[%s5509_s13 + $0x50] sm:$0xff] }
  0x89   : > { %1567 = vperm.xlu1 %4032, %v1489_v0   ;;  %1562 = vperm.xlu0 %4031, %v1488_v1   ;;  %v2489_v1 = vld [vmem:[%s5509_s13 + $0xc8] sm:$0xff] }
  0x8d   : > { %1557 = vperm.xlu1 %4032, %v1487_v2   ;;  %1552 = vperm.xlu0 %4031, %v1486_v3   ;;  %v2488_v2 = vld [vmem:[%s5509_s13 + $0xc0] sm:$0xff] }
  0x91   : > { %1547 = vperm.xlu1 %4032, %v1485_v4   ;;  %1542 = vperm.xlu0 %4031, %v1484_v5   ;;  %v2473_v5 = vld [vmem:[%s5509_s13 + $0x48] sm:$0xff] }
  0x95   : > { %1537 = vperm.xlu1 %4032, %v1483_v6   ;;  %1532 = vperm.xlu0 %4031, %v1482_v7   ;;  %v2472_v6 = vld [vmem:[%s5509_s13 + $0x40] sm:$0xff] }
  0x99   : > { %1527 = vperm.xlu1 %4032, %v1481_v8   ;;  %1522 = vperm.xlu0 %4031, %v1480_v9   ;;  %v2487_v8 = vld [vmem:[%s5509_s13 + $0xb8] sm:$0xff]  ;;  %v2486_v9 = vld [vmem:[%s5509_s13 + $0xb0] sm:$0xff] }
  0x9d   : > { %1517 = vperm.xlu1 %4032, %v1479_v10   ;;  %1512 = vperm.xlu0 %4031, %v1478_v13  }
  0xa1   : > { %1507 = vperm.xlu1 %4032, %v1477_v14   ;;  %1502 = vperm.xlu0 %4031, %v1476_v15  }
  0xa4   : > { %v4610_v37 = vpop.permute.xlu1 %721  ;;  %v4612_v38 = vpop.permute.xlu0 %731 }
  0xa5   : > { %1497 = vperm.xlu1 %4032, %v1475_v16   ;;  %1492 = vperm.xlu0 %4031, %v1474_v17   ;;  %v2471_v16 = vld [vmem:[%s5509_s13 + $0x38] sm:$0xff]  ;;  %v2470_v17 = vld [vmem:[%s5509_s13 + $0x30] sm:$0xff] }
  0xa8   : > { %v4626_v43 = vpop.permute.xlu1 %726  ;;  %v4628_v44 = vpop.permute.xlu0 %736 }
  0xa9   : > { %1800 = vperm.xlu1 %4032, %v1780_v18   ;;  %1810 = vperm.xlu0 %4031, %v1782_v19  }
  0xac   : > { %v4636_v47 = vpop.permute.xlu1 %716  ;;  %v4638_v48 = vpop.permute.xlu0 %711 }
  0xad   : > { %1795 = vperm.xlu1 %4032, %v1779_v20   ;;  %1805 = vperm.xlu0 %4031, %v1781_v21  }
  0xb0   : > { %v4652_v53 = vpop.permute.xlu1 %706  ;;  %v4654_v54 = vpop.permute.xlu0 %701 }
  0xb1   : > { %1790 = vperm.xlu1 %4032, %v1778_v22   ;;  %1785 = vperm.xlu0 %4031, %v1777_v23   ;;  %v2485_v22 = vld [vmem:[%s5509_s13 + $0xa8] sm:$0xff]  ;;  %v2484_v23 = vld [vmem:[%s5509_s13 + $0xa0] sm:$0xff] }
  0xb4   : > { %v4662_v57 = vpop.permute.xlu1 %696  ;;  %v4664_v58 = vpop.permute.xlu0 %691 }
  0xb5   : > { %2389 = vperm.xlu1 %4032, %v2311_v24   ;;  %2384 = vperm.xlu0 %4031, %v2310_v25  }
  0xb8   : > { %v4678_v63 = vpop.permute.xlu1 %686  ;;  %v4680_v0 = vpop.permute.xlu0 %681 }
  0xb9   : > { %2379 = vperm.xlu1 %4032, %v2309_v27   ;;  %2374 = vperm.xlu0 %4031, %v2308_v28   ;;  %v2468_v27 = vld [vmem:[%s5509_s13 + $0x20] sm:$0xff] }
  0xbc   : > { %v4688_v3 = vpop.permute.xlu1 %676  ;;  %v4690_v4 = vpop.permute.xlu0 %671 }
  0xbd   : > { %2369 = vperm.xlu1 %4032, %v2307_v29   ;;  %2364 = vperm.xlu0 %4031, %v2306_v30  }
  0xc0   : > { %v4706_v10 = vpop.permute.xlu1 %666  ;;  %v4708_v13 = vpop.permute.xlu0 %661 }
  0xc1   : > { %2359 = vperm.xlu1 %4032, %v2305_v31   ;;  %2354 = vperm.xlu0 %4031, %v2304_v32   ;;  %v2483_v32 = vld [vmem:[%s5509_s13 + $0x98] sm:$0xff] }
  0xc4   : > { %v4722_v19 = vpop.permute.xlu1 %1150  ;;  %v4724_v20 = vpop.permute.xlu0 %1145 }
  0xc5   : > { %2349 = vperm.xlu1 %4032, %v2303_v33   ;;  %2344 = vperm.xlu0 %4031, %v2302_v34   ;;  %v2482_v33 = vld [vmem:[%s5509_s13 + $0x90] sm:$0xff] }
  0xc8   : > { %v4744_v28 = vpop.permute.xlu1 %1070  ;;  %v4746_v29 = vpop.permute.xlu0 %1065 }
  0xc9   : > { %2339 = vperm.xlu1 %4032, %v2301_v35   ;;  %2334 = vperm.xlu0 %4031, %v2300_v36  }
  0xcc   : > { %v4756_v35 = vpop.permute.xlu1 %1140  ;;  %v4758_v36 = vpop.permute.xlu0 %1135 }
  0xcd   : > { %2329 = vperm.xlu1 %4032, %v2299_v39   ;;  %2324 = vperm.xlu0 %4031, %v2298_v40   ;;  %v2467_v40 = vld [vmem:[%s5509_s13 + $0x18] sm:$0xff] }
  0xd1   : > { %2319 = vperm.xlu1 %4032, %v2297_v41   ;;  %2314 = vperm.xlu0 %4031, %v2296_v42   ;;  %v2466_v41 = vld [vmem:[%s5509_s13 + $0x10] sm:$0xff] }
  0xd5   : > { %2653 = vperm.xlu1 %4032, %v2495_v45   ;;  %2648 = vperm.xlu0 %4031, %v2494_v46   ;;  %v2481_v46 = vld [vmem:[%s5509_s13 + $0x88] sm:$0xff] }
  0xd9   : > { %2573 = vperm.xlu1 %4032, %v2479_v49   ;;  %2568 = vperm.xlu0 %4031, %v2478_v50   ;;  %v2480_v49 = vld [vmem:[%s5509_s13 + $0x80] sm:$0xff]  ;;  %v4772_v50 = vpop.permute.xlu1 %1060 }
  0xdd   : > { %2643 = vperm.xlu1 %4032, %v2493_v51   ;;  %2638 = vperm.xlu0 %4031, %v2492_v52   ;;  %v4774_v51 = vpop.permute.xlu0 %1055 }
  0xe1   : > { %2563 = vperm.xlu1 %4032, %v2477_v55   ;;  %2558 = vperm.xlu0 %4031, %v2476_v56  }
  0xe5   : > { %2633 = vperm.xlu1 %4032, %v2491_v59   ;;  %2628 = vperm.xlu0 %4031, %v2490_v60   ;;  %v2465_v59 = vld [vmem:[%s5509_s13 + $0x8] sm:$0xff]  ;;  %v2464_v60 = vld [vmem:[%s5509_s13] sm:$0xff] }
  0xe9   : > { %2553 = vperm.xlu1 %4032, %v2475_v61   ;;  %2548 = vperm.xlu0 %4031, %v2474_v62  }
  0xed   : > { %2623 = vperm.xlu1 %4032, %v2489_v1   ;;  %2618 = vperm.xlu0 %4031, %v2488_v2   ;;  %v4785_v2 = vpop.permute.xlu1 %1130 }
  0xef   : > { %v4698_v7 = vpop.f32.mrf.mxu0 }
  0xf1   : > { %2543 = vperm.xlu1 %4032, %v2473_v5   ;;  %2538 = vperm.xlu0 %4031, %v2472_v6   ;;  %v4710_v14 = vpop.f32.mrf.mxu0 }
  0xf3   : > { %v4712_v15 = vpop.f32.mrf.mxu0 }
  0xf5   : > { %2613 = vperm.xlu1 %4032, %v2487_v8   ;;  %2608 = vperm.xlu0 %4031, %v2486_v9   ;;  %v4720_v18 = vpop.f32.mrf.mxu0  ;;  %v4789_v9 = vpop.permute.xlu0 %1125 }
  0xf7   : > { %v4726_v21 = vpop.f32.mrf.mxu0 }
  0xf9   : > { %2533 = vperm.xlu1 %4032, %v2471_v16   ;;  %2528 = vperm.xlu0 %4031, %v2470_v17   ;;  %v4734_v24 = vpop.f32.mrf.mxu0  ;;  %v2992_v16 = vld [vmem:[%s5511_s15 + $0x78] sm:$0xff] }
  0xfb   : > { %v4736_v25 = vpop.f32.mrf.mxu0 }
  0xfd   : > { %2603 = vperm.xlu1 %4032, %v2485_v22   ;;  %2598 = vperm.xlu0 %4031, %v2484_v23   ;;  %v4748_v30 = vpop.f32.mrf.mxu0 }
  0xff   : > { %v3813_v31 = vpop.f32.mrf.mxu0 }
 0x101   : > { %2523 = vperm.xlu1 %4032, %v2469_v26   ;;  %2518 = vperm.xlu0 %4031, %v2468_v27   ;;  %v874_v34 = vpop.f32.mrf.mxu0  ;;  %v2990_v27 = vld [vmem:[%s5511_s15 + $0x68] sm:$0xff] }
 0x103   : > { %v3814_v39 = vpop.f32.mrf.mxu0 }
 0x105   : > { %2593 = vperm.xlu1 %4032, %v2483_v32   ;;  %2588 = vperm.xlu0 %4031, %v2482_v33   ;;  %v877_v42 = vpop.f32.mrf.mxu0  ;;  %v875_v32 = vadd.f32 %v874_v34, %v4654_v54  ;;  %v2989_v33 = vld [vmem:[%s5511_s15 + $0x60] sm:$0xff]  ;;  %v867_v54 = vadd.f32 %v4726_v21, %v4664_v58  ;;  %v2986_v58 = vld [vmem:[%s5511_s15 + $0x48] sm:$0xff] }
 0x107   : > { %v3817_v45 = vpop.f32.mrf.mxu0  ;;  %v913_v34 = vmax.f32 %v875_v32, 0.0  ;;  %v911_v21 = vmax.f32 %v867_v54, 0.0  ;;  %v4048_v54 = vld [vmem:[%s5499_s3 + $0x38] sm:$0xff]  }
 0x108   : > { %v899_v55 = vadd.f32 %v3817_v45, %v4612_v38  ;;  %v886_v38 = vadd.f32 %v3814_v39, %v4636_v47  ;;  %v2991_v47 = vld [vmem:[%s5511_s15 + $0x70] sm:$0xff]  ;;  %v870_v39 = vadd.f32 %v4736_v25, %v4662_v57  ;;  %v862_v25 = vadd.f32 %v4748_v30, %v4678_v63 }
 0x109   : > { %2513 = vperm.xlu1 %4032, %v2467_v40   ;;  %2508 = vperm.xlu0 %4031, %v2466_v41   ;;  %v890_v52 = vpop.f32.mrf.mxu0  ;;  %v2987_v45 = vld [vmem:[%s5511_s15 + $0x50] sm:$0xff]  ;;  %v854_v63 = vadd.f32 %v4712_v15, %v4688_v3 }
 0x10a   : > { %v891_v61 = vadd.f32 %v890_v52, %v4610_v37  ;;  %v919_v5 = vmax.f32 %v899_v55, 0.0  ;;  %v883_v37 = vadd.f32 %v3813_v31, %v4638_v48  ;;  %v916_v23 = vmax.f32 %v886_v38, 0.0  ;;  %v4802_v48 = vpop.permute.xlu1 %1050  ;;  %v2983_v3 = vld [vmem:[%s5511_s15 + $0x30] sm:$0xff] }
 0x10b   : > { %v3818_v56 = vpop.f32.mrf.mxu0  ;;  %v912_v57 = vmax.f32 %v870_v39, 0.0  ;;  %v859_v55 = vadd.f32 %v4734_v24, %v4680_v0  ;;  %v851_v0 = vadd.f32 %v4698_v7, %v4690_v4  ;;  %v2982_v4 = vld [vmem:[%s5511_s15 + $0x28] sm:$0xff]  ;;  %v4044_v39 = vld [vmem:[%s5499_s3 + $0x18] sm:$0xff]  }
 0x10c   : > { %v902_v62 = vadd.f32 %v3818_v56, %v4628_v44  ;;  %v917_v44 = vmax.f32 %v891_v61, 0.0  ;;  %v915_v31 = vmax.f32 %v883_v37, 0.0  ;;  %v2985_v56 = vld [vmem:[%s5511_s15 + $0x40] sm:$0xff]  ;;  %v2980_v37 = vld [vmem:[%s5511_s15 + $0x18] sm:$0xff] }
 0x10d   : > { %2583 = vperm.xlu1 %4032, %v2481_v46   ;;  %2578 = vperm.xlu0 %4031, %v2480_v49   ;;  %v893_v1 = vpop.f32.mrf.mxu0  ;;  %v924_v30 = vpack.c.bf16 %v912_v57, %v911_v21  ;;  %v909_v24 = vmax.f32 %v859_v55, 0.0  ;;  %v907_v7 = vmax.f32 %v851_v0, 0.0  ;;  %v4051_v57 = vld [vmem:[%s5499_s3 + $0x50] sm:$0xff]   ;;  %v4056_v55 = vld [vmem:[%s5499_s3 + $0x78] sm:$0xff]  }
 0x10e   : > { %v920_v6 = vmax.f32 %v902_v62, 0.0  ;;  %v894_v8 = vadd.f32 %v893_v1, %v4626_v43  ;;  %v878_v43 = vadd.f32 %v877_v42, %v4652_v53  ;;  %v4808_v53 = vpop.permute.xlu0 %1045  ;;  %v926_v40 = vpack.c.bf16 %v916_v23, %v915_v31  ;;  %v2988_v42 = vld [vmem:[%s5511_s15 + $0x58] sm:$0xff]  ;;  %v4820_v46 = vpop.permute.xlu1 %1120  ;;  %v3322_v31 = vld [vmem:[%s5513_s17 + $0x1] sm:$0x1]  ;;  %v4055_v21 = vld [vmem:[%s5499_s3 + $0x70] sm:$0xff]  }
 0x10f   : > { %v908_v62 = vmax.f32 %v854_v63, 0.0  ;;  %v846_v1 = vadd.f32 %v4720_v18, %v4706_v10 }
 0x110   : > { %v918_v17 = vmax.f32 %v894_v8, 0.0  ;;  %v928_v22 = vpack.c.bf16 %v920_v6, %v919_v5  ;;  %v914_v41 = vmax.f32 %v878_v43, 0.0  ;;  %v843_v5 = vadd.f32 %v4710_v14, %v4708_v13  ;;  %v2981_v6 = vld [vmem:[%s5511_s15 + $0x20] sm:$0xff]  ;;  %v2979_v13 = vld [vmem:[%s5511_s15 + $0x10] sm:$0xff]  ;;  %v4042_v43 = vld [vmem:[%s5499_s3 + $0x8] sm:$0xff]  }
 0x111   : > { %2503 = vperm.xlu1 %4032, %v2465_v59   ;;  %2498 = vperm.xlu0 %4031, %v2464_v60   ;;  %v910_v59 = vmax.f32 %v862_v25, 0.0  ;;  %v2984_v60 = vld [vmem:[%s5511_s15 + $0x38] sm:$0xff]  ;;  %v922_v10 = vpack.c.bf16 %v908_v62, %v907_v7  ;;  %v906_v18 = vmax.f32 %v846_v1, 0.0 }
 0x112   : > { %v927_v26 = vpack.c.bf16 %v918_v17, %v917_v44  ;;  %3819 = vmatprep.subr.bf16.mxu1 %v928_v22  ;;  %v925_v49 = vpack.c.bf16 %v914_v41, %v913_v34  ;;  %v4824_v52 = vpop.permute.xlu0 %1115  ;;  %v4839_v61 = vpop.permute.xlu1 %1040  ;;  %v905_v44 = vmax.f32 %v843_v5, 0.0  ;;  %v2978_v17 = vld [vmem:[%s5511_s15 + $0x8] sm:$0xff]  ;;  %v4049_v34 = vld [vmem:[%s5499_s3 + $0x40] sm:$0xff]   ;;  %v4052_v25 = vld [vmem:[%s5499_s3 + $0x58] sm:$0xff]  }
 0x113   : > { %3820 = vmatpush3.bf16.msra.mxu1 %v928_v22  ;;  %v923_v38 = vpack.c.bf16 %v910_v59, %v909_v24  ;;  %v4046_v41 = vld [vmem:[%s5499_s3 + $0x28] sm:$0xff]  }
 0x114   : > { %3821 = vmatprep.subr.bf16.mxu1 %v927_v26  ;;  %v921_v14 = vpack.c.bf16 %v906_v18, %v905_v44 }
 0x115   : > { %3070 = vperm.xlu1 %4032, %v2992_v16   ;;  %3065 = vperm.xlu0 %4031, %v2991_v47   ;;  %v2977_v47 = vld [vmem:[%s5511_s15] sm:$0xff] }
 0x116   : > { %v4846_v15 = vpop.permute.xlu0 %1035  ;;  %v4858_v8 = vpop.permute.xlu1 %1110 }
 0x117   : > { %3822 = vmatpush3.bf16.msra.mxu1 %v927_v26  ;;  %v3315_v26 = vld [vmem:[%s5513_s17] sm:$0x1] }
 0x118   : > { %3823 = vmatprep.subr.bf16.mxu1 %v926_v40 }
 0x119   : > { %3060 = vperm.xlu1 %4032, %v2990_v27   ;;  %3055 = vperm.xlu0 %4031, %v2989_v33   ;;  %v4043_v27 = vld [vmem:[%s5499_s3 + $0x10] sm:$0xff]  }
 0x11a   : > { %v4860_v16 = vpop.permute.xlu0 %1105  ;;  %v4871_v22 = vpop.permute.xlu1 %1030 }
 0x11b   : > { %3824 = vmatpush3.bf16.msra.mxu1 %v926_v40  ;;  %v4045_v40 = vld [vmem:[%s5499_s3 + $0x20] sm:$0xff]  }
 0x11c   : > { %3825 = vmatprep.subr.bf16.mxu1 %v925_v49 }
 0x11d   : > { %3050 = vperm.xlu1 %4032, %v2988_v42   ;;  %3045 = vperm.xlu0 %4031, %v2987_v45   ;;  %v4047_v42 = vld [vmem:[%s5499_s3 + $0x30] sm:$0xff]   ;;  %v4050_v45 = vld [vmem:[%s5499_s3 + $0x48] sm:$0xff]  }
 0x11e   : > { %v4876_v23 = vpop.permute.xlu0 %1025  ;;  %v4890_v32 = vpop.permute.xlu1 %1100 }
 0x11f   : > { %3826 = vmatpush3.bf16.msra.mxu1 %v925_v49  ;;  %v4053_v49 = vld [vmem:[%s5499_s3 + $0x60] sm:$0xff]  }
 0x120   : > { %3827 = vmatprep.subr.bf16.mxu1 %v924_v30 }
 0x121   : > { %3040 = vperm.xlu1 %4032, %v2986_v58   ;;  %3035 = vperm.xlu0 %4031, %v2985_v56   ;;  %v4054_v58 = vld [vmem:[%s5499_s3 + $0x68] sm:$0xff]  }
 0x122   : > { %v4892_v33 = vpop.permute.xlu0 %1095  ;;  %v4059_v56 = vld [vmem:[%s5501_s5 + $0x4] ss:$8 sps:$4 sm:$0xff]  }
 0x123   : > { %3828 = vmatpush3.bf16.msra.mxu1 %v924_v30  ;;  %1682 = vmatprep.mubr.bf16.mxu0 %v4059_v56  ;;  %v1021_v30 = vpop.permute.xlu1 %1020 }
 0x124   : > { %3829 = vmatprep.subr.bf16.mxu1 %v923_v38 }
 0x125   : > { %3030 = vperm.xlu1 %4032, %v2984_v60   ;;  %3025 = vperm.xlu0 %4031, %v2983_v3  }
 0x126   : > { %v1016_v63 = vpop.permute.xlu0 %1015 }
 0x127   : > { %3830 = vmatpush3.bf16.msra.mxu1 %v923_v38  ;;  %v4938_v60 = vpop.permute.xlu1 %1090 }
 0x128   : > { %3831 = vmatprep.subr.bf16.mxu1 %v922_v10 }
 0x129   : > { %3020 = vperm.xlu1 %4032, %v2982_v4   ;;  %3015 = vperm.xlu0 %4031, %v2981_v6  }
 0x12a   : > { %v4936_v59 = vpop.permute.xlu0 %1085 }
 0x12b   : > { %3832 = vmatpush3.bf16.msra.mxu1 %v922_v10  ;;  %v1011_v24 = vpop.permute.xlu1 %1010 }
 0x12c   : > { %3833 = vmatprep.subr.bf16.mxu1 %v921_v14 }
 0x12d   : > { %3010 = vperm.xlu1 %4032, %v2980_v37   ;;  %3005 = vperm.xlu0 %4031, %v2979_v13  }
 0x12e   : > { %v1006_v0 = vpop.permute.xlu0 %1005 }
 0x12f   : > { %3834 = vmatpush3.bf16.msra.mxu1 %v921_v14  ;;  %v4942_v62 = vpop.permute.xlu1 %1080 }
 0x131   : > { %3000 = vperm.xlu1 %4032, %v2978_v17   ;;  %2995 = vperm.xlu0 %4031, %v2977_v47  }
 0x132   : > { %3836 = vmatmul.mubr.bf16.vlgmr.msra.gmra.mxu1 %v4042_v43  ;;  %v4940_v3 = vpop.permute.xlu0 %1075 }
 0x133   : > { %3839 = vmatprep.mubr.bf16.mxu1 %v4043_v27  ;;  %v1001_v18 = vpop.permute.xlu1 %1000 }
 0x135   : > { %3318 = vperm.xlu1 %4032, %v3315_v26   ;;  %3325 = vperm.xlu0 %4031, %v3322_v31  }
 0x136   : > { %v996_v7 = vpop.permute.xlu0 %995 }
 0x13a   : > { %3840 = vmatmul.mubr.bf16.gmra.mxu1 %v4044_v39 }
 0x13b   : > { %3843 = vmatprep.mubr.bf16.mxu1 %v4045_v40 }
 0x142   : > { %3844 = vmatmul.mubr.bf16.gmra.mxu1 %v4046_v41 }
 0x143   : > { %3847 = vmatprep.mubr.bf16.mxu1 %v4047_v42 }
 0x14a   : > { %3848 = vmatmul.mubr.bf16.gmra.mxu1 %v4048_v54 }
 0x14b   : > { %3851 = vmatprep.mubr.bf16.mxu1 %v4049_v34 }
 0x152   : > { %3852 = vmatmul.mubr.bf16.gmra.mxu1 %v4050_v45 }
 0x153   : > { %3855 = vmatprep.mubr.bf16.mxu1 %v4051_v57 }
 0x15a   : > { %3856 = vmatmul.mubr.bf16.gmra.mxu1 %v4052_v25 }
 0x15b   : > { %3859 = vmatprep.mubr.bf16.mxu1 %v4053_v49 }
 0x162   : > { %3860 = vmatmul.mubr.bf16.gmra.mxu1 %v4054_v58 }
 0x163   : > { %3863 = vmatprep.mubr.bf16.mxu1 %v4055_v21 }
 0x16a   : > { %3864 = vmatmul.mubr.bf16.gmra.mxu1 %v4056_v55 }
 0x1f2   : > { %v3837_v1 = vpop.f32.mrf.mxu1 }
 0x1f3   : > { %v1292_v4 = vadd.f32 %v3837_v1, %v1006_v0 }
 0x1f4   : > { %v1283_v38 = vpop.f32.mrf.mxu1 }
 0x1f5   : > { %v1284_v6 = vadd.f32 %v1283_v38, %v996_v7  ;;  %v1412_v44 = vmax.f32 %v1292_v4, 0.0 }
 0x1f6   : > { %v3838_v5 = vpop.f32.mrf.mxu1 }
 0x1f7   : > { %v1295_v10 = vadd.f32 %v3838_v5, %v1011_v24  ;;  %v1410_v47 = vmax.f32 %v1284_v6, 0.0 }
 0x1f8   : > { %v1286_v37 = vpop.f32.mrf.mxu1 }
 0x1f9   : > { %v1413_v13 = vmax.f32 %v1295_v10, 0.0  ;;  %v1287_v14 = vadd.f32 %v1286_v37, %v1001_v18 }
 0x1fa   : > { %v3841_v17 = vpop.f32.mrf.mxu1 }
 0x1fb   : > { %v4944_v43 = vpack.c.bf16 %v1413_v13, %v1412_v44  ;;  %v1411_v26 = vmax.f32 %v1287_v14, 0.0  ;;  %v1308_v39 = vadd.f32 %v3841_v17, %v4876_v23 }
 0x1fc   : > { %v1299_v27 = vpop.f32.mrf.mxu1 }
 0x1fd   : > { %v4946_v31 = vpack.c.bf16 %v1411_v26, %v1410_v47  ;;  %v1300_v41 = vadd.f32 %v1299_v27, %v1016_v63  ;;  %v1416_v34 = vmax.f32 %v1308_v39, 0.0 }
 0x1fe   : > { %v3842_v40 = vpop.f32.mrf.mxu1 }
 0x1ff   : > { %v1311_v42 = vadd.f32 %v3842_v40, %v4871_v22  ;;  %v1414_v49 = vmax.f32 %v1300_v41, 0.0 }
 0x200   : > { %v1302_v54 = vpop.f32.mrf.mxu1 }
 0x201   : > { %v1417_v45 = vmax.f32 %v1311_v42, 0.0  ;;  %v1303_v57 = vadd.f32 %v1302_v54, %v1021_v30 }
 0x202   : > { %v3845_v25 = vpop.f32.mrf.mxu1 }
 0x203   : > { %v4950_v58 = vpack.c.bf16 %v1417_v45, %v1416_v34  ;;  %v1415_v21 = vmax.f32 %v1303_v57, 0.0 }
 0x204   : > { %v1315_v55 = vpop.f32.mrf.mxu1 }
 0x205   : > { %v4952_v56 = vpack.c.bf16 %v1415_v21, %v1414_v49 }
 0x206   : > { %v3846_v0 = vpop.f32.mrf.mxu1 }
 0x208   : > { %v1318_v24 = vpop.f32.mrf.mxu1 }
 0x20a   : > { %v3849_v1 = vpop.f32.mrf.mxu1 }
 0x20b   : > { %v1340_v39 = vadd.f32 %v3849_v1, %v4746_v29 }
 0x20c   : > { %v1331_v23 = vpop.f32.mrf.mxu1 }
 0x20e   : > { %v3850_v38 = vpop.f32.mrf.mxu1 }
 0x20f   : > { %v1343_v47 = vadd.f32 %v3850_v38, %v4744_v28  ;;  %v1424_v38 = vmax.f32 %v1340_v39, 0.0 }
 0x210   : > { %v1334_v63 = vpop.f32.mrf.mxu1 }
 0x211   : > { %v1425_v54 = vmax.f32 %v1343_v47, 0.0  ;;  %v1335_v34 = vadd.f32 %v1334_v63, %v4772_v50 }
 0x212   : > { %v4954_v4 = vpop.f32.mrf.mxu1 }
 0x213   : > { %v1449_v47 = vpack.c.bf16 %v1425_v54, %v1424_v38  ;;  %v4183_v38 = vmov 0.0  }
 0x214   : > { %v4956_v22 = vpop.f32.mrf.mxu1  ;;  %3867 = vmatprep.subr.bf16.mxu1 %v4183_v38  ;;  %3883 = vmatprep.mubr.msk.bf16.mxu1 %vm4184_vm2, %v4183_v38 }
 0x216   : > { %v4958_v7 = vpop.f32.mrf.mxu1 }
 0x218   : > { %v4960_v30 = vpop.f32.mrf.mxu1 }
 0x21a   : > { %v3857_v5 = vpop.f32.mrf.mxu1 }
 0x21c   : > { %v1363_v6 = vpop.f32.mrf.mxu1 }
 0x21e   : > { %v3858_v10 = vpop.f32.mrf.mxu1 }
 0x220   : > { %v1366_v18 = vpop.f32.mrf.mxu1 }
 0x222   : > { %v3861_v37 = vpop.f32.mrf.mxu1 }
 0x223   : > { %v1388_v29 = vadd.f32 %v3861_v37, %v4789_v9 }
 0x224   : > { %v1379_v44 = vpop.f32.mrf.mxu1 }
 0x226   : > { %v3862_v13 = vpop.f32.mrf.mxu1 }
 0x227   : > { %v1391_v57 = vadd.f32 %v3862_v13, %v4785_v2  ;;  %v1324_v13 = vadd.f32 %v3845_v25, %v4808_v53  ;;  %v1372_v53 = vadd.f32 %v3857_v5, %v4860_v16  ;;  %v1356_v5 = vadd.f32 %v4954_v4, %v4936_v59  ;;  %v4071_v4 = vld [vmem:[%s5501_s5 + $0x40] ss:$8 sps:$4 sm:$0xff]  }
 0x228   : > { %v1382_v14 = vpop.f32.mrf.mxu1 }
 0x229   : > { %v1437_v50 = vmax.f32 %v1391_v57, 0.0  ;;  %v1383_v63 = vadd.f32 %v1382_v14, %v4820_v46  ;;  %v1316_v46 = vadd.f32 %v1315_v55, %v4846_v15  ;;  %v1359_v15 = vadd.f32 %v4958_v7, %v4938_v60  ;;  %v4075_v57 = vld [vmem:[%s5501_s5 + $0x64] ss:$8 sps:$4 sm:$0xff]  }
 0x22a   : > { %v3865_v17 = vpop.f32.mrf.mxu1 }
 0x22b   : > { %v1404_v27 = vadd.f32 %v3865_v17, %v4724_v20  ;;  %v1332_v20 = vadd.f32 %v1331_v23, %v4774_v51  ;;  %v1380_v51 = vadd.f32 %v1379_v44, %v4824_v52  ;;  %v1319_v23 = vadd.f32 %v1318_v24, %v4839_v61 }
 0x22c   : > { %v1395_v26 = vpop.f32.mrf.mxu1  ;;  %v1435_v39 = vmax.f32 %v1383_v63, 0.0  ;;  %v1367_v44 = vadd.f32 %v1366_v18, %v4890_v32  ;;  %v1418_v61 = vmax.f32 %v1316_v46, 0.0  ;;  %v1432_v24 = vmax.f32 %v1372_v53, 0.0 }
 0x22d   : > { %v1396_v41 = vadd.f32 %v1395_v26, %v4758_v36  ;;  %v1440_v49 = vmax.f32 %v1404_v27, 0.0  ;;  %v1423_v26 = vmax.f32 %v1335_v34, 0.0  ;;  %v1436_v27 = vmax.f32 %v1388_v29, 0.0  ;;  %v5045_v29 = vpop.permute.xlu1 %1567 }
 0x22e   : > { %v3866_v40 = vpop.f32.mrf.mxu1  ;;  %v1434_v25 = vmax.f32 %v1380_v51, 0.0  ;;  %v1431_v16 = vmax.f32 %v1367_v44, 0.0  ;;  %v1429_v32 = vmax.f32 %v1359_v15, 0.0  ;;  %v1351_v18 = vadd.f32 %v4960_v30, %v4942_v62  ;;  %v4057_v62 = vld [vmem:[%s5501_s5] ss:$8 sps:$4 sm:$0xff]  }
 0x22f   : > { %v1407_v42 = vadd.f32 %v3866_v40, %v4722_v19  ;;  %v1438_v1 = vmax.f32 %v1396_v41, 0.0  ;;  %v1327_v19 = vadd.f32 %v3846_v0, %v4802_v48  ;;  %v1375_v48 = vadd.f32 %v3858_v10, %v4858_v8  ;;  %v4074_v30 = vld [vmem:[%s5501_s5 + $0x50] ss:$8 sps:$4 sm:$0xff]  }
 0x230   : > { %v1398_v45 = vpop.f32.mrf.mxu1  ;;  %v1455_v0 = vpack.c.bf16 %v1437_v50, %v1436_v27  ;;  %v1420_v40 = vmax.f32 %v1324_v13, 0.0  ;;  %v1419_v41 = vmax.f32 %v1319_v23, 0.0  ;;  %v1364_v8 = vadd.f32 %v1363_v6, %v4892_v33 }
 0x231   : > { %v1441_v21 = vmax.f32 %v1407_v42, 0.0  ;;  %v1399_v28 = vadd.f32 %v1398_v45, %v4756_v35  ;;  %v1422_v35 = vmax.f32 %v1332_v20, 0.0  ;;  %v1421_v9 = vmax.f32 %v1327_v19, 0.0  ;;  %v5043_v20 = vpop.permute.xlu0 %1562 }
 0x232   : > { %v1433_v52 = vmax.f32 %v1375_v48, 0.0  ;;  %v1454_v42 = vpack.c.bf16 %v1435_v39, %v1434_v25  ;;  %v1446_v10 = vpack.c.bf16 %v1419_v41, %v1418_v61  ;;  %v1430_v54 = vmax.f32 %v1364_v8, 0.0 }
 0x233   : > { %v1457_v17 = vpack.c.bf16 %v1441_v21, %v1440_v49  ;;  %v1439_v36 = vmax.f32 %v1399_v28, 0.0  ;;  %v1448_v37 = vpack.c.bf16 %v1423_v26, %v1422_v35  ;;  %v1447_v14 = vpack.c.bf16 %v1421_v9, %v1420_v40  ;;  %v4077_v49 = vld [vmem:[%s5501_s5 + $0x60] ss:$8 sps:$4 sm:$0xff]   ;;  %v4078_v21 = vld [vmem:[%s5501_s5 + $0x74] ss:$8 sps:$4 sm:$0xff]  }
 0x234   : > { %v1453_v55 = vpack.c.bf16 %v1433_v52, %v1432_v24  ;;  %v1452_v34 = vpack.c.bf16 %v1431_v16, %v1430_v54  ;;  %v1428_v33 = vmax.f32 %v1356_v5, 0.0  ;;  %v1348_v6 = vadd.f32 %v4956_v22, %v4940_v3  ;;  %v4060_v3 = vld [vmem:[%s5501_s5 + $0x14] ss:$8 sps:$4 sm:$0xff]   ;;  %v4080_v28 = vld [vmem:[%s5501_s5 + $0x70] ss:$8 sps:$4 sm:$0xff]  }
 0x235   : > { %v1456_v2 = vpack.c.bf16 %v1439_v36, %v1438_v1  ;;  %3610 = vmatprep.subr.bf16.mxu0 %v1457_v17  ;;  %v1427_v7 = vmax.f32 %v1351_v18, 0.0  ;;  %v4072_v22 = vld [vmem:[%s5501_s5 + $0x54] ss:$8 sps:$4 sm:$0xff]   ;;  %v5047_v1 = vpop.permute.xlu0 %1552  ;;  %v5049_v17 = vpop.permute.xlu1 %1557 }
 0x236   : > { %3611 = vmatpush3.bf16.msra.mxu0 %v1449_v47  ;;  %v1451_v60 = vpack.c.bf16 %v1429_v32, %v1428_v33  ;;  %v1426_v45 = vmax.f32 %v1348_v6, 0.0 }
 0x237   : > { %3612 = vmatprep.subr.bf16.mxu0 %v1456_v2 }
 0x238   : > { %v1450_v59 = vpack.c.bf16 %v1427_v7, %v1426_v45 }
 0x239   : > { %v5053_v36 = vpop.permute.xlu0 %1542  ;;  %v5055_v19 = vpop.permute.xlu1 %1547 }
 0x23a   : > { %3613 = vmatpush3.bf16.msra.mxu0 %v1448_v37 }
 0x23b   : > { %3614 = vmatprep.subr.bf16.mxu0 %v1455_v0 }
 0x23d   : > { %v5057_v47 = vpop.permute.xlu0 %1532  ;;  %v5059_v26 = vpop.permute.xlu1 %1537 }
 0x23e   : > { %3615 = vmatpush3.bf16.msra.mxu0 %v1447_v14 }
 0x23f   : > { %3616 = vmatprep.subr.bf16.mxu0 %v1454_v42 }
 0x241   : > { %v5061_v50 = vpop.permute.xlu0 %1522  ;;  %v5063_v63 = vpop.permute.xlu1 %1527 }
 0x242   : > { %3617 = vmatpush3.bf16.msra.mxu0 %v1446_v10 }
 0x243   : > { %3618 = vmatprep.subr.bf16.mxu0 %v1453_v55 }
 0x245   : > { %v5065_v2 = vpop.permute.xlu0 %1512  ;;  %v5067_v13 = vpop.permute.xlu1 %1517 }
 0x246   : > { %3619 = vmatpush3.bf16.msra.mxu0 %v4950_v58  ;;  %v4063_v58 = vld [vmem:[%s5501_s5 + $0x24] ss:$8 sps:$4 sm:$0xff]  }
 0x247   : > { %3620 = vmatprep.subr.bf16.mxu0 %v1452_v34 }
 0x249   : > { %v1503_v35 = vpop.permute.xlu0 %1502  ;;  %v1508_v51 = vpop.permute.xlu1 %1507 }
 0x24a   : > { %3621 = vmatpush3.bf16.msra.mxu0 %v4952_v56  ;;  %v4069_v56 = vld [vmem:[%s5501_s5 + $0x44] ss:$8 sps:$4 sm:$0xff]  }
 0x24b   : > { %3622 = vmatprep.subr.bf16.mxu0 %v1451_v60 }
 0x24d   : > { %v1493_v48 = vpop.permute.xlu0 %1492  ;;  %v1498_v46 = vpop.permute.xlu1 %1497 }
 0x24e   : > { %3623 = vmatpush3.bf16.msra.mxu0 %v4944_v43  ;;  %v4062_v43 = vld [vmem:[%s5501_s5 + $0x10] ss:$8 sps:$4 sm:$0xff]  }
 0x24f   : > { %3624 = vmatprep.subr.bf16.mxu0 %v1450_v59 }
 0x252   : > { %3625 = vmatpush3.bf16.msra.mxu0 %v4946_v31  ;;  %v4065_v31 = vld [vmem:[%s5501_s5 + $0x20] ss:$8 sps:$4 sm:$0xff]  }
 0x253   : > { %4002 = vmatprep.subr.msk.bf16.mxu0 %vm804_vm1, %v4335_v11  ;;  %v4066_v11 = vld [vmem:[%s5501_s5 + $0x34] ss:$8 sps:$4 sm:$0xff]  }
 0x255   : > { %1683 = vmatmul.mubr.bf16.vlgmr.msra.gmra.mxu0 %v4057_v62 }
 0x256   : > { %1690 = vmatprep.mubr.bf16.mxu0 %v4060_v3  ;;  %3896 = vmatpush3.bf16.msra.mxu0 %v4340_v12  ;;  %v4068_v12 = vld [vmem:[%s5501_s5 + $0x30] ss:$8 sps:$4 sm:$0xff]  }
 0x25d   : > { %1691 = vmatmul.mubr.bf16.gmra.mxu0 %v4062_v43 }
 0x25e   : > { %1698 = vmatprep.mubr.bf16.mxu0 %v4063_v58 }
 0x265   : > { %1699 = vmatmul.mubr.bf16.gmra.mxu0 %v4065_v31 }
 0x266   : > { %1706 = vmatprep.mubr.bf16.mxu0 %v4066_v11 }
 0x26d   : > { %1707 = vmatmul.mubr.bf16.gmra.mxu0 %v4068_v12 }
 0x26e   : > { %1714 = vmatprep.mubr.bf16.mxu0 %v4069_v56 }
 0x275   : > { %1715 = vmatmul.mubr.bf16.gmra.mxu0 %v4071_v4 }
 0x276   : > { %1722 = vmatprep.mubr.bf16.mxu0 %v4072_v22 }
 0x27d   : > { %1723 = vmatmul.mubr.bf16.gmra.mxu0 %v4074_v30 }
 0x27e   : > { %1730 = vmatprep.mubr.bf16.mxu0 %v4075_v57 }
 0x285   : > { %1731 = vmatmul.mubr.bf16.gmra.mxu0 %v4077_v49 }
 0x286   : > { %1738 = vmatprep.mubr.bf16.mxu0 %v4078_v21 }
 0x28d   : > { %1739 = vmatmul.mubr.bf16.gmra.mxu0 %v4080_v28 }
 0x315   : > { %v3626_v27 = vpop.f32.mrf.mxu0 }
 0x317   : > { %v3627_v9 = vpop.f32.mrf.mxu0 }
 0x318   : > { %v3628_v23 = vadd.f32 %v3627_v9, %v3626_v27 }
 0x319   : > { %v3629_v37 = vpop.f32.mrf.mxu0 }
 0x31a   : > { %v1685_v39 = vadd.f32 %v3628_v23, %v1493_v48 }
 0x31b   : > { %v3630_v0 = vpop.f32.mrf.mxu0 }
 0x31c   : > { %v3631_v40 = vadd.f32 %v3630_v0, %v3629_v37  ;;  %v1747_v41 = vmax.f32 %v1685_v39, 0.0 }
 0x31d   : > { %v3632_v53 = vpop.f32.mrf.mxu0 }
 0x31e   : > { %v1688_v25 = vadd.f32 %v3631_v40, %v1498_v46 }
 0x31f   : > { %v3633_v14 = vpop.f32.mrf.mxu0 }
 0x320   : > { %v1748_v52 = vmax.f32 %v1688_v25, 0.0  ;;  %v3634_v44 = vadd.f32 %v3633_v14, %v3632_v53 }
 0x321   : > { %v3635_v42 = vpop.f32.mrf.mxu0 }
 0x322   : > { %v5069_v61 = vpack.c.bf16 %v1748_v52, %v1747_v41  ;;  %v1693_v8 = vadd.f32 %v3634_v44, %v1503_v35 }
 0x323   : > { %v3636_v24 = vpop.f32.mrf.mxu0 }
 0x324   : > { %v3637_v10 = vadd.f32 %v3636_v24, %v3635_v42  ;;  %v1749_v5 = vmax.f32 %v1693_v8, 0.0 }
 0x325   : > { %v3638_v15 = vpop.f32.mrf.mxu0 }
 0x326   : > { %v1696_v55 = vadd.f32 %v3637_v10, %v1508_v51 }
 0x327   : > { %v3639_v16 = vpop.f32.mrf.mxu0 }
 0x328   : > { %v1750_v54 = vmax.f32 %v1696_v55, 0.0  ;;  %v5071_v32 = vadd.f32 %v3639_v16, %v3638_v15 }
 0x329   : > { %v3641_v18 = vpop.f32.mrf.mxu0 }
 0x32a   : > { %v5073_v34 = vpack.c.bf16 %v1750_v54, %v1749_v5 }
 0x32b   : > { %v3642_v33 = vpop.f32.mrf.mxu0 }
 0x32d   : > { %v3644_v6 = vpop.f32.mrf.mxu0 }
 0x32f   : > { %v3645_v60 = vpop.f32.mrf.mxu0 }
 0x331   : > { %v3647_v7 = vpop.f32.mrf.mxu0 }
 0x333   : > { %v3648_v45 = vpop.f32.mrf.mxu0 }
 0x335   : > { %v3650_v59 = vpop.f32.mrf.mxu0 }
 0x337   : > { %v3651_v62 = vpop.f32.mrf.mxu0 }
 0x338   : > { %v3652_v44 = vadd.f32 %v3651_v62, %v3650_v59  ;;  %v4088_v59 = vld [vmem:[%s5506_s10 + $0x10] sm:$0xff]   ;;  %v4089_v62 = vld [vmem:[%s5506_s10 + $0x18] sm:$0xff]  }
 0x339   : > { %v3653_v3 = vpop.f32.mrf.mxu0 }
 0x33a   : > { %v1717_v10 = vadd.f32 %v3652_v44, %v5057_v47  ;;  %v1701_v47 = vadd.f32 %v5071_v32, %v5065_v2  ;;  %v4081_v2 = vld [vmem:[%s5503_s7] sm:$0xff]   ;;  %v4083_v32 = vld [vmem:[%s5503_s7 + $0x10] sm:$0xff]  }
 0x33b   : > { %v3654_v43 = vpop.f32.mrf.mxu0 }
 0x33c   : > { %v3655_v25 = vadd.f32 %v3654_v43, %v3653_v3  ;;  %v1755_v54 = vmax.f32 %v1717_v10, 0.0  ;;  %v4092_v3 = vld [vmem:[%s5506_s10 + $0x20] sm:$0xff]   ;;  %v4093_v43 = vld [vmem:[%s5506_s10 + $0x28] sm:$0xff]  }
 0x33d   : > { %v3656_v58 = vpop.f32.mrf.mxu0 }
 0x33f   : > { %v3657_v31 = vpop.f32.mrf.mxu0 }
 0x340   : > { %v3658_v39 = vadd.f32 %v3657_v31, %v3656_v58  ;;  %v4096_v58 = vld [vmem:[%s5506_s10 + $0x30] sm:$0xff]   ;;  %v4097_v31 = vld [vmem:[%s5506_s10 + $0x38] sm:$0xff]  }
 0x341   : > { %v3659_v11 = vpop.f32.mrf.mxu0 }
 0x342   : > { %v1725_v42 = vadd.f32 %v3658_v39, %v5053_v36 }
 0x343   : > { %v3660_v12 = vpop.f32.mrf.mxu0 }
 0x344   : > { %v3661_v37 = vadd.f32 %v3660_v12, %v3659_v11  ;;  %v1757_v15 = vmax.f32 %v1725_v42, 0.0 }
 0x345   : > { %v3662_v56 = vpop.f32.mrf.mxu0 }
 0x346   : > { %v1728_v14 = vadd.f32 %v3661_v37, %v5055_v19  ;;  %v3643_v19 = vadd.f32 %v3642_v33, %v3641_v18  ;;  %v1751_v33 = vmax.f32 %v1701_v47, 0.0 }
 0x347   : > { %v3663_v4 = vpop.f32.mrf.mxu0 }
 0x348   : > { %v3664_v51 = vadd.f32 %v3663_v4, %v3662_v56  ;;  %v1758_v24 = vmax.f32 %v1728_v14, 0.0 }
 0x349   : > { %v3665_v22 = vpop.f32.mrf.mxu0 }
 0x34a   : > { %v1733_v40 = vadd.f32 %v3664_v51, %v5047_v1  ;;  %v3646_v1 = vadd.f32 %v3645_v60, %v3644_v6  ;;  %v1768_v16 = vpack.c.bf16 %v1758_v24, %v1757_v15 }
 0x34b   : > { %v3666_v30 = vpop.f32.mrf.mxu0 }
 0x34c   : > { %v3667_v35 = vadd.f32 %v3666_v30, %v3665_v22  ;;  %v1709_v5 = vadd.f32 %v3646_v1, %v5061_v50  ;;  %v1811_v30 = vpop.permute.xlu0 %1810 }
 0x34d   : > { %v3668_v57 = vpop.f32.mrf.mxu0 }
 0x34e   : > { %v1736_v48 = vadd.f32 %v3667_v35, %v5049_v17  ;;  %v3649_v17 = vadd.f32 %v3648_v45, %v3647_v7  ;;  %v1753_v7 = vmax.f32 %v1709_v5, 0.0  ;;  %v4086_v45 = vld [vmem:[%s5505_s9] sm:$0xff]  }
 0x34f   : > { %v3669_v49 = vpop.f32.mrf.mxu0 }
 0x350   : > { %v3670_v21 = vadd.f32 %v3669_v49, %v3668_v57  ;;  %v1760_v41 = vmax.f32 %v1736_v48, 0.0  ;;  %v1712_v55 = vadd.f32 %v3649_v17, %v5063_v63  ;;  %v1801_v49 = vpop.permute.xlu1 %1800  ;;  %v1806_v51 = vpop.permute.xlu0 %1805 }
 0x351   : > { %v3671_v28 = vpop.f32.mrf.mxu0 }
 0x352   : > { %v1741_v9 = vadd.f32 %v3670_v21, %v5043_v20  ;;  %v1759_v20 = vmax.f32 %v1733_v40, 0.0  ;;  %v1754_v6 = vmax.f32 %v1712_v55, 0.0 }
 0x353   : > { %v3672_v27 = vpop.f32.mrf.mxu0 }
 0x354   : > { %v3673_v23 = vadd.f32 %v3672_v27, %v3671_v28  ;;  %v1761_v46 = vmax.f32 %v1741_v9, 0.0  ;;  %v1769_v8 = vpack.c.bf16 %v1760_v41, %v1759_v20  ;;  %v1766_v18 = vpack.c.bf16 %v1754_v6, %v1753_v7  ;;  %v1796_v24 = vpop.permute.xlu1 %1795  ;;  %v1786_v15 = vpop.permute.xlu0 %1785 }
 0x356   : > { %v1744_v0 = vadd.f32 %v3673_v23, %v5045_v29  ;;  %v1720_v29 = vadd.f32 %v3655_v25, %v5059_v26  ;;  %v1704_v26 = vadd.f32 %v3643_v19, %v5067_v13  ;;  %v4082_v13 = vld [vmem:[%s5503_s7 + $0x8] sm:$0xff]  }
 0x358   : > { %v1762_v53 = vmax.f32 %v1744_v0, 0.0  ;;  %v1756_v36 = vmax.f32 %v1720_v29, 0.0  ;;  %v1752_v63 = vmax.f32 %v1704_v26, 0.0  ;;  %v1791_v6 = vpop.permute.xlu1 %1790 }
 0x35a   : > { %v1770_v52 = vpack.c.bf16 %v1762_v53, %v1761_v46  ;;  %v1767_v60 = vpack.c.bf16 %v1756_v36, %v1755_v54  ;;  %v1765_v50 = vpack.c.bf16 %v1752_v63, %v1751_v33 }
 0x35c   : > { %3868 = vmatpush3.bf16.msra.mxu1 %v1770_v52 }
 0x35d   : > { %3869 = vmatprep.subr.bf16.mxu1 %v4183_v38 }
 0x360   : > { %3870 = vmatpush3.bf16.msra.mxu1 %v1769_v8 }
 0x361   : > { %3871 = vmatprep.subr.bf16.mxu1 %v4183_v38 }
 0x364   : > { %3872 = vmatpush3.bf16.msra.mxu1 %v1768_v16 }
 0x365   : > { %3873 = vmatprep.subr.bf16.mxu1 %v4183_v38 }
 0x368   : > { %3874 = vmatpush3.bf16.msra.mxu1 %v1767_v60 }
 0x369   : > { %3875 = vmatprep.subr.bf16.mxu1 %v4183_v38 }
 0x36c   : > { %3876 = vmatpush3.bf16.msra.mxu1 %v1766_v18 }
 0x36d   : > { %3877 = vmatprep.subr.bf16.mxu1 %v4183_v38 }
 0x370   : > { %3878 = vmatpush3.bf16.msra.mxu1 %v1765_v50 }
 0x371   : > { %3879 = vmatprep.subr.bf16.mxu1 %v4183_v38 }
 0x374   : > { %3880 = vmatpush3.bf16.msra.mxu1 %v5073_v34  ;;  %v4085_v34 = vld [vmem:[%s5506_s10 + $0x8] sm:$0xff]  }
 0x375   : > { %3881 = vmatprep.subr.bf16.mxu1 %v4183_v38 }
 0x378   : > { %3882 = vmatpush3.bf16.msra.mxu1 %v5069_v61  ;;  %v4084_v61 = vld [vmem:[%s5506_s10] sm:$0xff]  }
 0x379   : > { %3897 = vmatprep.mubr.msk.bf16.mxu0 %vm779_vm0, %v4084_v61 }
 0x37a   : > { %3898 = vmatmul.mubr.msk.bf16.vlgmr.msra.gmra.mxu0 %vm779_vm0, %v4085_v34 }
 0x37b   : > { %3884 = vmatmul.mubr.bf16.vlgmr.msra.gmra.mxu1 %v4081_v2  ;;  %3901 = vmatprep.mubr.msk.bf16.mxu0 %vm779_vm0, %v4088_v59 }
 0x37c   : > { %3887 = vmatprep.mubr.msk.bf16.mxu1 %vm4184_vm2, %v4183_v38 }
 0x382   : > { %3902 = vmatmul.mubr.msk.bf16.gmra.mxu0 %vm779_vm0, %v4089_v62 }
 0x383   : > { %3888 = vmatmul.mubr.bf16.gmra.mxu1 %v4082_v13  ;;  %3905 = vmatprep.mubr.msk.bf16.mxu0 %vm779_vm0, %v4092_v3 }
 0x384   : > { %3891 = vmatprep.mubr.msk.bf16.mxu1 %vm4184_vm2, %v4183_v38 }
 0x38a   : > { %3906 = vmatmul.mubr.msk.bf16.gmra.mxu0 %vm779_vm0, %v4093_v43  ;;  %v623_v43 = vld [vmem:[%s4332_s27 + $0x10] sm:$0xff] }
 0x38b   : > { %3892 = vmatmul.mubr.bf16.gmra.mxu1 %v4083_v32  ;;  %3909 = vmatprep.mubr.msk.bf16.mxu0 %vm779_vm0, %v4096_v58 }
 0x38c   : > { %3917 = vmatprep.mubr.msk.bf16.mxu1 %vm2171_vm3, %v4086_v45 }
 0x392   : > { %3910 = vmatmul.mubr.msk.bf16.gmra.mxu0 %vm779_vm0, %v4097_v31 }
 0x43b   : > { %v1865_v11 = vpop.f32.mrf.mxu1 }
 0x43c   : > { %v1866_v55 = vadd.f32 %v1865_v11, %v1786_v15 }
 0x43d   : > { %v3885_v12 = vpop.f32.mrf.mxu1 }
 0x43e   : > { %v3358_v7 = vmul.f32 %v1866_v55, %v1866_v55  ;;  %v622_v12 = vld [vmem:[%s4332_s27 + $0x8] sm:$0xff] }
 0x43f   : > { %v1868_v56 = vpop.f32.mrf.mxu1 }
 0x440   : > { %v1869_v63 = vadd.f32 %v1868_v56, %v1791_v6 }
 0x441   : > { %v3886_v4 = vpop.f32.mrf.mxu1 }
 0x442   : > { %v3359_v62 = vmul.f32 %v1869_v63, %v1869_v63  ;;  %v624_v4 = vld [vmem:[%s4332_s27 + $0x18] sm:$0xff] }
 0x443   : > { %v5146_v22 = vpop.f32.mrf.mxu1 }
 0x444   : > { %v1874_v3 = vadd.f32 %v5146_v22, %v1796_v24 }
 0x445   : > { %v3889_v57 = vpop.f32.mrf.mxu1 }
 0x447   : > { %v1876_v21 = vpop.f32.mrf.mxu1 }
 0x448   : > { %v1877_v28 = vadd.f32 %v1876_v21, %v1801_v49  ;;  %v3360_v49 = vmul.f32 %v1874_v3, %v1874_v3 }
 0x449   : > { %v3890_v35 = vpop.f32.mrf.mxu1 }
 0x44a   : > { %v1891_v27 = vmin.f32 %v1877_v28, 20.0  ;;  %vm1888_vm5 = vcmp.gt.f32.partialorder %v1877_v28, 20.0 }
 0x44b   : > { %v1881_v9 = vpop.f32.mrf.mxu1 }
 0x44c   : > { %v1894_v23 = vmul.f32 1.442695, %v1891_v27  ;;  %v1882_v37 = vadd.f32 %v1881_v9, %v1806_v51 }
 0x44d   : > { %v3893_v48 = vpop.f32.mrf.mxu1 }
 0x44e   : > { %4140 = vpow2.f32 %v1894_v23  ;;  %v1892_v0 = vmin.f32 %v1882_v37, 20.0  ;;  %vm1889_vm7 = vcmp.gt.f32.partialorder %v1882_v37, 20.0 }
 0x44f   : > { %v1884_v39 = vpop.f32.mrf.mxu1 }
 0x450   : > { %v1896_v40 = vmul.f32 1.442695, %v1892_v0  ;;  %v5148_v46 = vadd.f32 %v1884_v39, %v1811_v30 }
 0x451   : > { %v3894_v53 = vpop.f32.mrf.mxu1 }
 0x452   : > { %4142 = vpow2.f32 %v1896_v40  ;;  %v1893_v25 = vmin.f32 %v5148_v46, 20.0  ;;  %vm1890_vm9 = vcmp.gt.f32.partialorder %v5148_v46, 20.0 }
 0x454   : > { %v1898_v14 = vmul.f32 1.442695, %v1893_v25 }
 0x456   : > { %4144 = vpow2.f32 %v1898_v14  ;;  %v3342_v14 = vlaneseq }
 0x45b   : > { %v4141_v41 = vpop.eup %4140 }
 0x45c   : > { %v1900_v52 = vadd.f32 1.0, %v4141_v41  ;;  %v1903_v17 = vmul.f32 -0.5, %v4141_v41  ;;  %v1906_v10 = vand.u32 2147483647, %v4141_v41 }
 0x45e   : > { %4146 = vlog2.f32 %v1900_v52  ;;  %v1904_v8 = vadd.f32 1.0, %v1903_v17  ;;  %vm1907_vm4 = vcmp.lt.f32.partialorder %v1906_v10, 0.0004427343  ;;  %v3343_v17 = vshrl.u32 %v3342_v14, 7 }
 0x45f   : > { %v4143_v44 = vpop.eup %4142 }
 0x460   : > { %v1909_v42 = vadd.f32 1.0, %v4143_v44  ;;  %v1912_v1 = vmul.f32 -0.5, %v4143_v44  ;;  %v1905_v16 = vmul.f32 %v4141_v41, %v1904_v8  ;;  %v1915_v54 = vand.u32 2147483647, %v4143_v44 }
 0x462   : > { %4148 = vlog2.f32 %v1909_v42  ;;  %v1913_v5 = vadd.f32 1.0, %v1912_v1  ;;  %vm1916_vm6 = vcmp.lt.f32.partialorder %v1915_v54, 0.0004427343  ;;  %v4091_v54 = vld [vmem:[%s5505_s9 + $0x18] sm:$0xff]  }
 0x463   : > { %v4145_v20 = vpop.eup %4144 }
 0x464   : > { %v1918_v29 = vadd.f32 1.0, %v4145_v20  ;;  %v1921_v26 = vmul.f32 -0.5, %v4145_v20  ;;  %v1914_v2 = vmul.f32 %v4143_v44, %v1913_v5  ;;  %v1924_v34 = vand.u32 2147483647, %v4145_v20  ;;  %v4087_v44 = vld [vmem:[%s5505_s9 + $0x8] sm:$0xff]  }
 0x466   : > { %4150 = vlog2.f32 %v1918_v29  ;;  %v1922_v13 = vadd.f32 1.0, %v1921_v26  ;;  %vm1925_vm8 = vcmp.lt.f32.partialorder %v1924_v34, 0.0004427343  ;;  %v4090_v29 = vld [vmem:[%s5505_s9 + $0x10] sm:$0xff]   ;;  %v4094_v26 = vld [vmem:[%s5505_s9 + $0x20] sm:$0xff]  }
 0x468   : > { %v1923_v11 = vmul.f32 %v4145_v20, %v1922_v13 }
 0x46b   : > { %v4147_v19 = vpop.eup %4146 }
 0x46c   : > { %v1902_v36 = vmul.f32 0.6931472, %v4147_v19  ;;  %v3345_v19 = vadd.s32 16, %v3343_v17 }
 0x46e   : > { %v1908_v60 = vsel %vm1907_vm4, %v1905_v16, %v1902_v36  ;;  %vm3375_vm10 = vcmp.lt.s32.totalorder %v3345_v19, 20 }
 0x46f   : > { %v4149_v47 = vpop.eup %4148  ;;  %v1927_v18 = vsel %vm1888_vm5, %v1877_v28, %v1908_v60 }
 0x470   : > { %4152 = vlog2.f32 %v1927_v18  ;;  %v3355_v33 = vmul.f32 %v1927_v18, %v1927_v18  ;;  %v1911_v50 = vmul.f32 0.6931472, %v4149_v47  ;;  %v1930_v28 = vmul.f32 %v1927_v18, %v622_v12  ;;  %v4099_v18 = vld [vmem:[%s5505_s9 + $0x38] sm:$0xff]  }
 0x472   : > { %v3361_v32 = vadd.f32 %v3358_v7, %v3355_v33  ;;  %v1917_v61 = vsel %vm1916_vm6, %v1914_v2, %v1911_v50  ;;  %v1933_v48 = vadd.f32 %v1930_v28, %v1866_v55  ;;  %v4095_v7 = vld [vmem:[%s5505_s9 + $0x28] sm:$0xff]   ;;  %v4100_v33 = vld [vmem:[%s5508_s12] sm:$0xff]   ;;  %v5192_v50 = vpop.f32.mrf.mxu0 }
 0x473   : > { %v4151_v45 = vpop.eup %4150  ;;  %v1928_v59 = vsel %vm1889_vm7, %v1882_v37, %v1917_v61  ;;  %3949 = vmatprep.mubr.bf16.mxu0 %v4100_v33 }
 0x474   : > { %4154 = vlog2.f32 %v1928_v59  ;;  %v3356_v58 = vmul.f32 %v1928_v59, %v1928_v59  ;;  %v1920_v31 = vmul.f32 0.6931472, %v4151_v45  ;;  %v1931_v30 = vmul.f32 %v1928_v59, %v623_v43  ;;  %v5194_v2 = vpop.f32.mrf.mxu0 }
 0x475   : > { %v3364_v25 = vmul.f32 0.5, %v3361_v32 }
 0x476   : > { %v3362_v56 = vadd.f32 %v3359_v62, %v3356_v58  ;;  %v1926_v57 = vsel %vm1925_vm8, %v1923_v11, %v1920_v31  ;;  %v1934_v9 = vadd.f32 %v1931_v30, %v1869_v63  ;;  %v4098_v63 = vld [vmem:[%s5505_s9 + $0x30] sm:$0xff]   ;;  %v5196_v13 = vpop.f32.mrf.mxu0 }
 0x477   : > { %v1929_v21 = vsel %vm1890_vm9, %v5148_v46, %v1926_v57  ;;  %v2385_v57 = vpop.permute.xlu0 %2384 }
 0x478   : > { %v1932_v35 = vmul.f32 %v1929_v21, %v624_v4  ;;  %4156 = vlog2.f32 %v1929_v21  ;;  %v3357_v22 = vmul.f32 %v1929_v21, %v1929_v21  ;;  %v1936_v40 = vpack.c.bf16 %v1934_v9, %v1933_v48  ;;  %v5198_v32 = vpop.f32.mrf.mxu0 }
 0x479   : > { %v3365_v20 = vmul.f32 0.5, %v3362_v56  ;;  %v2390_v56 = vpop.permute.xlu1 %2389 }
 0x47a   : > { %v3363_v27 = vadd.f32 %v3360_v49, %v3357_v22  ;;  %v1935_v51 = vadd.f32 %v1932_v35, %v1874_v3  ;;  %v5200_v61 = vpop.f32.mrf.mxu0 }
 0x47c   : > { %v1937_v37 = vpack.c.bf16 %v1935_v51, %v1935_v51  ;;  %v3366_v36 = vmul.f32 0.5, %v3363_v27  ;;  %v5202_v34 = vpop.f32.mrf.mxu0  ;;  %v2375_v27 = vpop.permute.xlu0 %2374 }
 0x47d   : > { %v4153_v23 = vpop.eup %4152  ;;  %v2380_v35 = vpop.permute.xlu1 %2379 }
 0x47e   : > { %v3347_v0 = vmul.f32 0.6931472, %v4153_v23  ;;  %4003 = vmatprep.subr.msk.bf16.mxu1 %vm804_vm1, %v1937_v37  ;;  %v2197_v39 = vsel %vm804_vm1, %v1937_v37, 0  ;;  %v3904_v45 = vpop.f32.mrf.mxu0 }
 0x47f   : > { %3914 = vmatpush3.bf16.msra.mxu1 %v2197_v39 }
 0x480   : > { %v3352_v53 = vsub.f32 0.0, %v3347_v0  ;;  %3915 = vmatprep.subr.bf16.mxu1 %v1936_v40  ;;  %v5204_v59 = vpop.f32.mrf.mxu0  ;;  %v2365_v39 = vpop.permute.xlu0 %2364 }
 0x481   : > { %v4155_v46 = vpop.eup %4154  ;;  %v2370_v37 = vpop.permute.xlu1 %2369 }
 0x482   : > { %v3367_v41 = vadd.f32 %v3364_v25, %v3352_v53  ;;  %v3349_v52 = vmul.f32 0.6931472, %v4155_v46  ;;  %v3907_v43 = vpop.f32.mrf.mxu0 }
 0x483   : > { %3916 = vmatpush3.bf16.msra.mxu1 %v1936_v40 }
 0x484   : > { %v3353_v42 = vsub.f32 0.0, %v3349_v52  ;;  %v3572_v10 = vadd.f32 -0.5, %v3367_v41  ;;  %v2100_v11 = vpop.f32.mrf.mxu0 }
 0x485   : > { %v4157_v24 = vpop.eup %4156  ;;  %v2360_v41 = vpop.permute.xlu1 %2359 }
 0x486   : > { %v3368_v8 = vadd.f32 %v3365_v20, %v3353_v42  ;;  %v3351_v1 = vmul.f32 0.6931472, %v4157_v24  ;;  %3918 = vmatmul.mubr.msk.bf16.vlgmr.msra.gmra.mxu1 %vm2171_vm3, %v4087_v44  ;;  %v3908_v30 = vpop.f32.mrf.mxu0  ;;  %v2355_v42 = vpop.permute.xlu0 %2354 }
 0x487   : > { %3921 = vmatprep.mubr.msk.bf16.mxu1 %vm2171_vm3, %v4090_v29 }
 0x488   : > { %v3573_v15 = vadd.f32 -0.5, %v3368_v8  ;;  %v3354_v55 = vsub.f32 0.0, %v3351_v1  ;;  %v2103_v28 = vpop.f32.mrf.mxu0 }
 0x48a   : > { %v3385_v16 = vadd.f32 %v3573_v15, %v3572_v10  ;;  %v3369_v5 = vadd.f32 %v3366_v36, %v3354_v55  ;;  %v3911_v51 = vpop.f32.mrf.mxu0 }
 0x48c   : > { %v3574_v6 = vadd.f32 -0.5, %v3369_v5  ;;  %v2116_v48 = vpop.f32.mrf.mxu0 }
 0x48e   : > { %v3384_v60 = vsel %vm3375_vm10, %v3574_v6, 0.0  ;;  %3922 = vmatmul.mubr.msk.bf16.gmra.mxu1 %vm2171_vm3, %v4091_v54  ;;  %v3912_v25 = vpop.f32.mrf.mxu0  ;;  %v2350_v54 = vpop.permute.xlu1 %2349 }
 0x48f   : > { %v5174_v47 = vadd.f32 %v3385_v16, %v3384_v60  ;;  %3925 = vmatprep.mubr.msk.bf16.mxu1 %vm2171_vm3, %v4094_v26 }
 0x490   : > { %v2119_v24 = vpop.f32.mrf.mxu0 }
 0x496   : > { %3926 = vmatmul.mubr.msk.bf16.gmra.mxu1 %vm2171_vm3, %v4095_v7 }
 0x497   : > { %3929 = vmatprep.mubr.msk.bf16.mxu1 %vm2171_vm3, %v4098_v63 }
 0x49e   : > { %3930 = vmatmul.mubr.msk.bf16.gmra.mxu1 %vm2171_vm3, %v4099_v18  ;;  %v2345_v18 = vpop.permute.xlu0 %2344 }
 0x546   : > { %v5206_v62 = vpop.f32.mrf.mxu1 }
 0x548   : > { %v5208_v3 = vpop.f32.mrf.mxu1 }
 0x54a   : > { %v5210_v58 = vpop.f32.mrf.mxu1 }
 0x54c   : > { %v5212_v31 = vpop.f32.mrf.mxu1 }
 0x54e   : > { %v3923_v12 = vpop.f32.mrf.mxu1 }
 0x550   : > { %v5214_v4 = vpop.f32.mrf.mxu1 }
 0x552   : > { %v3924_v49 = vpop.f32.mrf.mxu1 }
 0x553   : > { %v2261_v33 = vadd.f32 %v3924_v49, %v3904_v45  ;;  %v2250_v45 = vadd.f32 %v5214_v4, %v5202_v34  ;;  %v2237_v34 = vadd.f32 %v5212_v31, %v5198_v32 }
 0x554   : > { %v2252_v21 = vpop.f32.mrf.mxu1 }
 0x556   : > { %v3927_v22 = vpop.f32.mrf.mxu1 }
 0x557   : > { %v2274_v29 = vadd.f32 %v3927_v22, %v3907_v43 }
 0x558   : > { %v2265_v9 = vpop.f32.mrf.mxu1 }
 0x559   : > { %v2402_v26 = vadd.f32 %v2365_v39, %v2274_v29  ;;  %v2266_v6 = vadd.f32 %v2265_v9, %v2100_v11 }
 0x55a   : > { %v3928_v23 = vpop.f32.mrf.mxu1 }
 0x55b   : > { %v2277_v52 = vadd.f32 %v3928_v23, %v3908_v30  ;;  %v2418_v22 = vmax.f32 %v2402_v26, 0.0  ;;  %v2335_v23 = vpop.permute.xlu0 %2334  ;;  %v4114_v26 = vld [vmem:[%s5508_s12 + $0x70] sm:$0xff]  }
 0x55c   : > { %v2268_v0 = vpop.f32.mrf.mxu1 }
 0x55d   : > { %v2403_v19 = vadd.f32 %v2370_v37, %v2277_v52  ;;  %v2269_v55 = vadd.f32 %v2268_v0, %v2103_v28  ;;  %v2400_v28 = vadd.f32 %v2355_v42, %v2266_v6  ;;  %v4115_v6 = vld [vmem:[%s5508_s12 + $0x78] sm:$0xff]  }
 0x55e   : > { %v3931_v40 = vpop.f32.mrf.mxu1 }
 0x55f   : > { %v2290_v53 = vadd.f32 %v3931_v40, %v3911_v51  ;;  %v2419_v30 = vmax.f32 %v2403_v19, 0.0  ;;  %v2401_v43 = vadd.f32 %v2360_v41, %v2269_v55  ;;  %v2253_v51 = vadd.f32 %v2252_v21, %v5204_v59  ;;  %v4108_v19 = vld [vmem:[%s5508_s12 + $0x40] sm:$0xff]   ;;  %v4109_v55 = vld [vmem:[%s5508_s12 + $0x48] sm:$0xff]  }
 0x560   : > { %v2281_v14 = vpop.f32.mrf.mxu1  ;;  %v2416_v49 = vmax.f32 %v2400_v28, 0.0  ;;  %v2242_v59 = vadd.f32 %v5206_v62, %v5192_v50  ;;  %v2396_v40 = vadd.f32 %v2335_v23, %v2250_v45 }
 0x561   : > { %v2282_v46 = vadd.f32 %v2281_v14, %v2116_v48  ;;  %v2406_v20 = vadd.f32 %v2385_v57, %v2290_v53  ;;  %v2417_v11 = vmax.f32 %v2401_v43, 0.0  ;;  %v2429_v9 = vpack.c.bf16 %v2419_v30, %v2418_v22  ;;  %v2325_v53 = vpop.permute.xlu0 %2324 }
 0x562   : > { %v3932_v44 = vpop.f32.mrf.mxu1 }
 0x563   : > { %v2293_v17 = vadd.f32 %v3932_v44, %v3912_v25  ;;  %v2404_v1 = vadd.f32 %v2375_v27, %v2282_v46  ;;  %v2422_v36 = vmax.f32 %v2406_v20, 0.0  ;;  %v2340_v27 = vpop.permute.xlu1 %2339  ;;  %v2428_v0 = vpack.c.bf16 %v2417_v11, %v2416_v49  ;;  %v4118_v49 = vld [vmem:[%s5510_s14 + $0x4] ss:$8 sps:$4 sm:$0xff]  }
 0x564   : > { %v2284_v8 = vpop.f32.mrf.mxu1  ;;  %v2397_v48 = vadd.f32 %v2340_v27, %v2253_v51  ;;  %v2412_v46 = vmax.f32 %v2396_v40, 0.0  ;;  %3185 = vmatprep.mubr.bf16.mxu1 %v4118_v49 }
 0x565   : > { %v2407_v10 = vadd.f32 %v2390_v56, %v2293_v17  ;;  %v2285_v15 = vadd.f32 %v2284_v8, %v2119_v24  ;;  %v2420_v60 = vmax.f32 %v2404_v1, 0.0  ;;  %v2258_v56 = vadd.f32 %v3923_v12, %v5200_v61  ;;  %v2315_v44 = vpop.permute.xlu0 %2314  ;;  %v4103_v24 = vld [vmem:[%s5508_s12 + $0x18] sm:$0xff]   ;;  %v4104_v8 = vld [vmem:[%s5508_s12 + $0x20] sm:$0xff]   ;;  %v4105_v1 = vld [vmem:[%s5508_s12 + $0x28] sm:$0xff]  }
 0x566   : > { %v2245_v61 = vadd.f32 %v5210_v58, %v5196_v13  ;;  %v2413_v4 = vmax.f32 %v2397_v48, 0.0  ;;  %v2394_v13 = vadd.f32 %v2325_v53, %v2242_v59  ;;  %v2234_v58 = vadd.f32 %v5208_v3, %v5194_v2  ;;  %v4101_v2 = vld [vmem:[%s5508_s12 + $0x8] sm:$0xff]   ;;  %v4102_v3 = vld [vmem:[%s5508_s12 + $0x10] sm:$0xff]  }
 0x567   : > { %v2423_v16 = vmax.f32 %v2407_v10, 0.0  ;;  %v2405_v5 = vadd.f32 %v2380_v35, %v2285_v15  ;;  %v2399_v35 = vadd.f32 %v2350_v54, %v2261_v33  ;;  %v2398_v37 = vadd.f32 %v2345_v18, %v2258_v56  ;;  %v2330_v39 = vpop.permute.xlu1 %2329  ;;  %v4106_v10 = vld [vmem:[%s5508_s12 + $0x30] sm:$0xff]   ;;  %v4107_v15 = vld [vmem:[%s5508_s12 + $0x38] sm:$0xff]   ;;  %v4113_v54 = vld [vmem:[%s5508_s12 + $0x68] sm:$0xff]  }
 0x568   : > { %v2395_v25 = vadd.f32 %v2330_v39, %v2245_v61  ;;  %v2426_v62 = vpack.c.bf16 %v2413_v4, %v2412_v46  ;;  %v2410_v42 = vmax.f32 %v2394_v13, 0.0  ;;  %v2392_v20 = vadd.f32 %v2315_v44, %v2234_v58 }
 0x569   : > { %v2421_v7 = vmax.f32 %v2405_v5, 0.0  ;;  %v2431_v63 = vpack.c.bf16 %v2423_v16, %v2422_v36  ;;  %v2415_v12 = vmax.f32 %v2399_v35, 0.0  ;;  %v2414_v21 = vmax.f32 %v2398_v37, 0.0  ;;  %v4110_v36 = vld [vmem:[%s5508_s12 + $0x50] sm:$0xff]   ;;  %v4111_v16 = vld [vmem:[%s5508_s12 + $0x58] sm:$0xff]   ;;  %v4112_v5 = vld [vmem:[%s5508_s12 + $0x60] sm:$0xff]  }
 0x56a   : > { %v2411_v52 = vmax.f32 %v2395_v25, 0.0  ;;  %v2408_v31 = vmax.f32 %v2392_v20, 0.0 }
 0x56b   : > { %3933 = vmatprep.subr.bf16.mxu0 %v2431_v63  ;;  %v2430_v57 = vpack.c.bf16 %v2421_v7, %v2420_v60  ;;  %v2427_v14 = vpack.c.bf16 %v2415_v12, %v2414_v21  ;;  %v2320_v41 = vpop.permute.xlu1 %2319  ;;  %v5276_v60 = vpop.permute.xlu0 %2648 }
 0x56c   : > { %3934 = vmatpush3.bf16.msra.mxu0 %v2431_v63  ;;  %v2393_v50 = vadd.f32 %v2320_v41, %v2237_v34  ;;  %v2425_v32 = vpack.c.bf16 %v2411_v52, %v2410_v42 }
 0x56d   : > { %3935 = vmatprep.subr.bf16.mxu0 %v2430_v57 }
 0x56e   : > { %v2409_v17 = vmax.f32 %v2393_v50, 0.0 }
 0x56f   : > { %v5278_v7 = vpop.permute.xlu1 %2653  ;;  %v5280_v63 = vpop.permute.xlu0 %2568 }
 0x570   : > { %3936 = vmatpush3.bf16.msra.mxu0 %v2430_v57  ;;  %v2424_v29 = vpack.c.bf16 %v2409_v17, %v2408_v31 }
 0x571   : > { %3937 = vmatprep.subr.bf16.mxu0 %v2429_v9 }
 0x573   : > { %v5282_v18 = vpop.permute.xlu1 %2573  ;;  %v5284_v33 = vpop.permute.xlu0 %2638 }
 0x574   : > { %3938 = vmatpush3.bf16.msra.mxu0 %v2429_v9 }
 0x575   : > { %3939 = vmatprep.subr.bf16.mxu0 %v2428_v0 }
 0x577   : > { %v5286_v30 = vpop.permute.xlu1 %2643  ;;  %v5288_v43 = vpop.permute.xlu0 %2558 }
 0x578   : > { %3940 = vmatpush3.bf16.msra.mxu0 %v2428_v0 }
 0x579   : > { %3941 = vmatprep.subr.bf16.mxu0 %v2427_v14 }
 0x57b   : > { %v5290_v57 = vpop.permute.xlu1 %2563  ;;  %v5292_v56 = vpop.permute.xlu0 %2628 }
 0x57c   : > { %3942 = vmatpush3.bf16.msra.mxu0 %v2427_v14 }
 0x57d   : > { %3943 = vmatprep.subr.bf16.mxu0 %v2426_v62 }
 0x57f   : > { %v5294_v22 = vpop.permute.xlu1 %2633  ;;  %v5296_v28 = vpop.permute.xlu0 %2548 }
 0x580   : > { %3944 = vmatpush3.bf16.msra.mxu0 %v2426_v62 }
 0x581   : > { %3945 = vmatprep.subr.bf16.mxu0 %v2425_v32 }
 0x583   : > { %v5298_v27 = vpop.permute.xlu1 %2553  ;;  %v5300_v35 = vpop.permute.xlu0 %2618 }
 0x584   : > { %3946 = vmatpush3.bf16.msra.mxu0 %v2425_v32 }
 0x585   : > { %3947 = vmatprep.subr.bf16.mxu0 %v2424_v29 }
 0x587   : > { %v5302_v51 = vpop.permute.xlu1 %2623  ;;  %v5304_v11 = vpop.permute.xlu0 %2538 }
 0x588   : > { %3948 = vmatpush3.bf16.msra.mxu0 %v2424_v29 }
 0x589   : > { %3981 = vmatprep.subr.bf16.mxu0 %v4183_v38 }
 0x58b   : > { %3950 = vmatmul.mubr.bf16.vlgmr.msra.gmra.mxu0 %v4101_v2  ;;  %v5306_v9 = vpop.permute.xlu1 %2543  ;;  %v5308_v23 = vpop.permute.xlu0 %2608 }
 0x58c   : > { %3953 = vmatprep.mubr.bf16.mxu0 %v4102_v3 }
 0x58f   : > { %v5310_v37 = vpop.permute.xlu1 %2613  ;;  %v2529_v45 = vpop.permute.xlu0 %2528 }
 0x593   : > { %3954 = vmatmul.mubr.bf16.gmra.mxu0 %v4103_v24  ;;  %v2534_v61 = vpop.permute.xlu1 %2533  ;;  %v5315_v12 = vpop.permute.xlu0 %2598 }
 0x594   : > { %3957 = vmatprep.mubr.bf16.mxu0 %v4104_v8 }
 0x597   : > { %v5317_v48 = vpop.permute.xlu1 %2603  ;;  %v2519_v0 = vpop.permute.xlu0 %2518 }
 0x59b   : > { %3958 = vmatmul.mubr.bf16.gmra.mxu0 %v4105_v1  ;;  %v2524_v39 = vpop.permute.xlu1 %2523  ;;  %v5319_v59 = vpop.permute.xlu0 %2588 }
 0x59c   : > { %3961 = vmatprep.mubr.bf16.mxu0 %v4106_v10 }
 0x59f   : > { %v5321_v21 = vpop.permute.xlu1 %2593  ;;  %v2509_v40 = vpop.permute.xlu0 %2508 }
 0x5a3   : > { %3962 = vmatmul.mubr.bf16.gmra.mxu0 %v4107_v15  ;;  %v2514_v53 = vpop.permute.xlu1 %2513  ;;  %v5323_v25 = vpop.permute.xlu0 %2578 }
 0x5a4   : > { %3965 = vmatprep.mubr.bf16.mxu0 %v4108_v19 }
 0x5a7   : > { %v5325_v34 = vpop.permute.xlu1 %2583  ;;  %v2499_v58 = vpop.permute.xlu0 %2498 }
 0x5ab   : > { %3966 = vmatmul.mubr.bf16.gmra.mxu0 %v4109_v55  ;;  %v2504_v50 = vpop.permute.xlu1 %2503 }
 0x5ac   : > { %3969 = vmatprep.mubr.bf16.mxu0 %v4110_v36 }
 0x5b3   : > { %3970 = vmatmul.mubr.bf16.gmra.mxu0 %v4111_v16 }
 0x5b4   : > { %3973 = vmatprep.mubr.bf16.mxu0 %v4112_v5 }
 0x5bb   : > { %3974 = vmatmul.mubr.bf16.gmra.mxu0 %v4113_v54 }
 0x5bc   : > { %3977 = vmatprep.mubr.bf16.mxu0 %v4114_v26 }
 0x5c3   : > { %3978 = vmatmul.mubr.bf16.gmra.mxu0 %v4115_v6 }
 0x5c4   : > { %3997 = vmatprep.mubr.msk.bf16.mxu0 %vm4184_vm2, %v4183_v38 }
 0x64b   : > { %v3951_v4 = vpop.f32.mrf.mxu0 }
 0x64c   : > { %v2795_v13 = vadd.f32 %v3951_v4, %v2509_v40 }
 0x64d   : > { %v2786_v14 = vpop.f32.mrf.mxu0 }
 0x64e   : > { %v2787_v41 = vadd.f32 %v2786_v14, %v2499_v58  ;;  %v2915_v44 = vmax.f32 %v2795_v13, 0.0 }
 0x64f   : > { %v3952_v46 = vpop.f32.mrf.mxu0 }
 0x650   : > { %v2798_v52 = vadd.f32 %v3952_v46, %v2514_v53  ;;  %v2913_v32 = vmax.f32 %v2787_v41, 0.0 }
 0x651   : > { %v2789_v62 = vpop.f32.mrf.mxu0 }
 0x652   : > { %v2916_v42 = vmax.f32 %v2798_v52, 0.0  ;;  %v2790_v20 = vadd.f32 %v2789_v62, %v2504_v50 }
 0x653   : > { %v3955_v17 = vpop.f32.mrf.mxu0 }
 0x654   : > { %v5327_v31 = vpack.c.bf16 %v2916_v42, %v2915_v44  ;;  %v2914_v29 = vmax.f32 %v2790_v20, 0.0  ;;  %v2811_v24 = vadd.f32 %v3955_v17, %v2529_v45 }
 0x655   : > { %v2802_v2 = vpop.f32.mrf.mxu0 }
 0x656   : > { %v5329_v3 = vpack.c.bf16 %v2914_v29, %v2913_v32  ;;  %v2803_v1 = vadd.f32 %v2802_v2, %v2519_v0  ;;  %v2919_v19 = vmax.f32 %v2811_v24, 0.0 }
 0x657   : > { %v3956_v8 = vpop.f32.mrf.mxu0 }
 0x658   : > { %v2814_v10 = vadd.f32 %v3956_v8, %v2534_v61  ;;  %v2917_v5 = vmax.f32 %v2803_v1, 0.0 }
 0x659   : > { %v2805_v15 = vpop.f32.mrf.mxu0 }
 0x65a   : > { %v2920_v55 = vmax.f32 %v2814_v10, 0.0  ;;  %v2806_v36 = vadd.f32 %v2805_v15, %v2524_v39 }
 0x65b   : > { %v3959_v16 = vpop.f32.mrf.mxu0 }
 0x65c   : > { %v5331_v54 = vpack.c.bf16 %v2920_v55, %v2919_v19  ;;  %v2918_v26 = vmax.f32 %v2806_v36, 0.0 }
 0x65d   : > { %v2818_v6 = vpop.f32.mrf.mxu0 }
 0x65e   : > { %v5333_v49 = vpack.c.bf16 %v2918_v26, %v2917_v5 }
 0x65f   : > { %v3960_v40 = vpop.f32.mrf.mxu0 }
 0x661   : > { %v2821_v53 = vpop.f32.mrf.mxu0 }
 0x663   : > { %v3963_v4 = vpop.f32.mrf.mxu0 }
 0x664   : > { %v2843_v24 = vadd.f32 %v3963_v4, %v5280_v63 }
 0x665   : > { %v2834_v14 = vpop.f32.mrf.mxu0 }
 0x667   : > { %v3964_v45 = vpop.f32.mrf.mxu0 }
 0x668   : > { %v2846_v32 = vadd.f32 %v3964_v45, %v5282_v18  ;;  %v2927_v45 = vmax.f32 %v2843_v24, 0.0 }
 0x669   : > { %v2837_v13 = vpop.f32.mrf.mxu0 }
 0x66a   : > { %v2928_v15 = vmax.f32 %v2846_v32, 0.0  ;;  %v2838_v19 = vadd.f32 %v2837_v13, %v5290_v57 }
 0x66b   : > { %v5335_v0 = vpop.f32.mrf.mxu0 }
 0x66c   : > { %v2952_v32 = vpack.c.bf16 %v2928_v15, %v2927_v45  ;;  %v4137_v45 = vld [vmem:[%s5510_s14 + $0x74] ss:$8 sps:$4 sm:$0xff]  }
 0x66d   : > { %v5337_v61 = vpop.f32.mrf.mxu0 }
 0x66f   : > { %v5339_v58 = vpop.f32.mrf.mxu0 }
 0x671   : > { %v5341_v39 = vpop.f32.mrf.mxu0 }
 0x673   : > { %v3971_v46 = vpop.f32.mrf.mxu0 }
 0x675   : > { %v2866_v41 = vpop.f32.mrf.mxu0 }
 0x677   : > { %v3972_v52 = vpop.f32.mrf.mxu0 }
 0x679   : > { %v2869_v50 = vpop.f32.mrf.mxu0 }
 0x67b   : > { %v3975_v62 = vpop.f32.mrf.mxu0 }
 0x67c   : > { %v2891_v63 = vadd.f32 %v3975_v62, %v5292_v56 }
 0x67d   : > { %v2882_v44 = vpop.f32.mrf.mxu0 }
 0x67f   : > { %v3976_v42 = vpop.f32.mrf.mxu0 }
 0x680   : > { %v2894_v36 = vadd.f32 %v3976_v42, %v5294_v22  ;;  %v2827_v42 = vadd.f32 %v3959_v16, %v5296_v28  ;;  %v2875_v28 = vadd.f32 %v3971_v46, %v5308_v23  ;;  %v2859_v46 = vadd.f32 %v5335_v0, %v5319_v59  ;;  %v4127_v0 = vld [vmem:[%s5510_s14 + $0x30] ss:$8 sps:$4 sm:$0xff]  }
 0x681   : > { %v2885_v20 = vpop.f32.mrf.mxu0 }
 0x682   : > { %v2940_v57 = vmax.f32 %v2894_v36, 0.0  ;;  %v2886_v13 = vadd.f32 %v2885_v20, %v5302_v51  ;;  %v2819_v51 = vadd.f32 %v2818_v6, %v5304_v11  ;;  %v2862_v11 = vadd.f32 %v5339_v58, %v5321_v21  ;;  %v4131_v36 = vld [vmem:[%s5510_s14 + $0x54] ss:$8 sps:$4 sm:$0xff]  }
 0x683   : > { %v3979_v17 = vpop.f32.mrf.mxu0 }
 0x684   : > { %v2907_v2 = vadd.f32 %v3979_v17, %v5276_v60  ;;  %v2835_v60 = vadd.f32 %v2834_v14, %v5288_v43  ;;  %v2883_v43 = vadd.f32 %v2882_v44, %v5300_v35  ;;  %v2822_v14 = vadd.f32 %v2821_v53, %v5306_v9 }
 0x685   : > { %v2898_v29 = vpop.f32.mrf.mxu0  ;;  %v2938_v24 = vmax.f32 %v2886_v13, 0.0  ;;  %v2870_v44 = vadd.f32 %v2869_v50, %v5317_v48  ;;  %v2921_v9 = vmax.f32 %v2819_v51, 0.0  ;;  %v2935_v53 = vmax.f32 %v2875_v28, 0.0 }
 0x686   : > { %v2899_v1 = vadd.f32 %v2898_v29, %v5284_v33  ;;  %v2943_v5 = vmax.f32 %v2907_v2, 0.0  ;;  %v2926_v29 = vmax.f32 %v2838_v19, 0.0  ;;  %v2939_v2 = vmax.f32 %v2891_v63, 0.0  ;;  %v5420_v63 = vpop.permute.xlu0 %3065 }
 0x687   : > { %v3980_v8 = vpop.f32.mrf.mxu0  ;;  %v2937_v16 = vmax.f32 %v2883_v43, 0.0  ;;  %v2934_v23 = vmax.f32 %v2870_v44, 0.0  ;;  %v2932_v48 = vmax.f32 %v2862_v11, 0.0  ;;  %v2854_v50 = vadd.f32 %v5341_v39, %v5325_v34  ;;  %v4116_v34 = vld [vmem:[%s5510_s14] ss:$8 sps:$4 sm:$0xff]  }
 0x688   : > { %v2910_v10 = vadd.f32 %v3980_v8, %v5278_v7  ;;  %v2941_v4 = vmax.f32 %v2899_v1, 0.0  ;;  %v2830_v7 = vadd.f32 %v3960_v40, %v5298_v27  ;;  %v2878_v27 = vadd.f32 %v3972_v52, %v5310_v37  ;;  %v4130_v39 = vld [vmem:[%s5510_s14 + $0x40] ss:$8 sps:$4 sm:$0xff]  }
 0x689   : > { %v2901_v55 = vpop.f32.mrf.mxu0  ;;  %v2958_v40 = vpack.c.bf16 %v2940_v57, %v2939_v2  ;;  %v2923_v8 = vmax.f32 %v2827_v42, 0.0  ;;  %v2922_v1 = vmax.f32 %v2822_v14, 0.0  ;;  %v2867_v37 = vadd.f32 %v2866_v41, %v5315_v12 }
 0x68a   : > { %v2944_v26 = vmax.f32 %v2910_v10, 0.0  ;;  %v2902_v18 = vadd.f32 %v2901_v55, %v5286_v30  ;;  %v2925_v30 = vmax.f32 %v2835_v60, 0.0  ;;  %v2924_v56 = vmax.f32 %v2830_v7, 0.0  ;;  %v4139_v60 = vld [vmem:[%s5510_s14 + $0x70] ss:$8 sps:$4 sm:$0xff]  }
 0x68b   : > { %v2936_v35 = vmax.f32 %v2878_v27, 0.0  ;;  %v2957_v10 = vpack.c.bf16 %v2938_v24, %v2937_v16  ;;  %v2949_v52 = vpack.c.bf16 %v2922_v1, %v2921_v9  ;;  %v2933_v15 = vmax.f32 %v2867_v37, 0.0 }
 0x68c   : > { %v2960_v17 = vpack.c.bf16 %v2944_v26, %v2943_v5  ;;  %v2942_v33 = vmax.f32 %v2902_v18, 0.0  ;;  %v2951_v62 = vpack.c.bf16 %v2926_v29, %v2925_v30  ;;  %v2950_v20 = vpack.c.bf16 %v2924_v56, %v2923_v8  ;;  %v4133_v5 = vld [vmem:[%s5510_s14 + $0x50] ss:$8 sps:$4 sm:$0xff]   ;;  %v4134_v26 = vld [vmem:[%s5510_s14 + $0x64] ss:$8 sps:$4 sm:$0xff]  }
 0x68d   : > { %v2956_v6 = vpack.c.bf16 %v2936_v35, %v2935_v53  ;;  %v2955_v19 = vpack.c.bf16 %v2934_v23, %v2933_v15  ;;  %v2931_v12 = vmax.f32 %v2859_v46, 0.0  ;;  %v2851_v41 = vadd.f32 %v5337_v61, %v5323_v25  ;;  %v4119_v25 = vld [vmem:[%s5510_s14 + $0x14] ss:$8 sps:$4 sm:$0xff]   ;;  %v4128_v61 = vld [vmem:[%s5510_s14 + $0x44] ss:$8 sps:$4 sm:$0xff]  }
 0x68e   : > { %v2959_v22 = vpack.c.bf16 %v2942_v33, %v2941_v4  ;;  %3728 = vmatprep.subr.bf16.mxu1 %v2960_v17  ;;  %v2930_v58 = vmax.f32 %v2854_v50, 0.0  ;;  %v4136_v18 = vld [vmem:[%s5510_s14 + $0x60] ss:$8 sps:$4 sm:$0xff]   ;;  %v5422_v4 = vpop.permute.xlu1 %3070  ;;  %v5424_v17 = vpop.permute.xlu0 %3055 }
 0x68f   : > { %3729 = vmatpush3.bf16.msra.mxu1 %v2952_v32  ;;  %v2954_v21 = vpack.c.bf16 %v2932_v48, %v2931_v12  ;;  %v2929_v55 = vmax.f32 %v2851_v41, 0.0 }
 0x690   : > { %3730 = vmatprep.subr.bf16.mxu1 %v2959_v22 }
 0x691   : > { %v2953_v59 = vpack.c.bf16 %v2930_v58, %v2929_v55 }
 0x692   : > { %v5426_v33 = vpop.permute.xlu1 %3060  ;;  %v5428_v7 = vpop.permute.xlu0 %3045 }
 0x693   : > { %3731 = vmatpush3.bf16.msra.mxu1 %v2951_v62 }
 0x694   : > { %3732 = vmatprep.subr.bf16.mxu1 %v2958_v40 }
 0x696   : > { %v5430_v32 = vpop.permute.xlu1 %3050  ;;  %v5432_v29 = vpop.permute.xlu0 %3035 }
 0x697   : > { %3733 = vmatpush3.bf16.msra.mxu1 %v2950_v20 }
 0x698   : > { %3734 = vmatprep.subr.bf16.mxu1 %v2957_v10 }
 0x69a   : > { %v5434_v57 = vpop.permute.xlu1 %3040  ;;  %v5436_v13 = vpop.permute.xlu0 %3025 }
 0x69b   : > { %3735 = vmatpush3.bf16.msra.mxu1 %v2949_v52 }
 0x69c   : > { %3736 = vmatprep.subr.bf16.mxu1 %v2956_v6 }
 0x69e   : > { %v5438_v22 = vpop.permute.xlu1 %3030  ;;  %v5440_v42 = vpop.permute.xlu0 %3015 }
 0x69f   : > { %3737 = vmatpush3.bf16.msra.mxu1 %v5331_v54  ;;  %v4121_v54 = vld [vmem:[%s5510_s14 + $0x10] ss:$8 sps:$4 sm:$0xff]  }
 0x6a0   : > { %3738 = vmatprep.subr.bf16.mxu1 %v2955_v19 }
 0x6a2   : > { %v5442_v30 = vpop.permute.xlu1 %3020  ;;  %v3006_v2 = vpop.permute.xlu0 %3005 }
 0x6a3   : > { %3739 = vmatpush3.bf16.msra.mxu1 %v5333_v49  ;;  %v4125_v49 = vld [vmem:[%s5510_s14 + $0x34] ss:$8 sps:$4 sm:$0xff]  }
 0x6a4   : > { %3740 = vmatprep.subr.bf16.mxu1 %v2954_v21 }
 0x6a6   : > { %v3011_v56 = vpop.permute.xlu1 %3010  ;;  %v2996_v40 = vpop.permute.xlu0 %2995 }
 0x6a7   : > { %3741 = vmatpush3.bf16.msra.mxu1 %v5327_v31  ;;  %v4122_v31 = vld [vmem:[%s5510_s14 + $0x24] ss:$8 sps:$4 sm:$0xff]  }
 0x6a8   : > { %3742 = vmatprep.subr.bf16.mxu1 %v2953_v59 }
 0x6aa   : > { %v3001_v28 = vpop.permute.xlu1 %3000 }
 0x6ab   : > { %3743 = vmatpush3.bf16.msra.mxu1 %v5329_v3  ;;  %v4124_v3 = vld [vmem:[%s5510_s14 + $0x20] ss:$8 sps:$4 sm:$0xff]  }
 0x6ae   : > { %3186 = vmatmul.mubr.bf16.vlgmr.msra.gmra.mxu1 %v4116_v34 }
 0x6af   : > { %3193 = vmatprep.mubr.bf16.mxu1 %v4119_v25 }
 0x6b6   : > { %3194 = vmatmul.mubr.bf16.gmra.mxu1 %v4121_v54 }
 0x6b7   : > { %3201 = vmatprep.mubr.bf16.mxu1 %v4122_v31 }
 0x6be   : > { %3202 = vmatmul.mubr.bf16.gmra.mxu1 %v4124_v3 }
 0x6bf   : > { %3209 = vmatprep.mubr.bf16.mxu1 %v4125_v49 }
 0x6c6   : > { %3210 = vmatmul.mubr.bf16.gmra.mxu1 %v4127_v0 }
 0x6c7   : > { %3217 = vmatprep.mubr.bf16.mxu1 %v4128_v61 }
 0x6ce   : > { %3218 = vmatmul.mubr.bf16.gmra.mxu1 %v4130_v39 }
 0x6cf   : > { %3225 = vmatprep.mubr.bf16.mxu1 %v4131_v36 }
 0x6d6   : > { %3226 = vmatmul.mubr.bf16.gmra.mxu1 %v4133_v5 }
 0x6d7   : > { %3233 = vmatprep.mubr.bf16.mxu1 %v4134_v26 }
 0x6de   : > { %3234 = vmatmul.mubr.bf16.gmra.mxu1 %v4136_v18 }
 0x6df   : > { %3241 = vmatprep.mubr.bf16.mxu1 %v4137_v45 }
 0x6e6   : > { %3242 = vmatmul.mubr.bf16.gmra.mxu1 %v4139_v60 }
 0x76e   : > { %v3744_v43 = vpop.f32.mrf.mxu1 }
 0x770   : > { %v3745_v14 = vpop.f32.mrf.mxu1 }
 0x771   : > { %v3746_v62 = vadd.f32 %v3745_v14, %v3744_v43 }
 0x772   : > { %v3747_v27 = vpop.f32.mrf.mxu1 }
 0x773   : > { %v3188_v8 = vadd.f32 %v3746_v62, %v2996_v40 }
 0x774   : > { %v3748_v24 = vpop.f32.mrf.mxu1 }
 0x775   : > { %v3749_v51 = vadd.f32 %v3748_v24, %v3747_v27  ;;  %v3250_v35 = vmax.f32 %v3188_v8, 0.0 }
 0x776   : > { %v3750_v16 = vpop.f32.mrf.mxu1 }
 0x777   : > { %v3191_v20 = vadd.f32 %v3749_v51, %v3001_v28 }
 0x778   : > { %v3751_v1 = vpop.f32.mrf.mxu1 }
 0x779   : > { %v3251_v44 = vmax.f32 %v3191_v20, 0.0  ;;  %v3752_v10 = vadd.f32 %v3751_v1, %v3750_v16 }
 0x77a   : > { %v3753_v9 = vpop.f32.mrf.mxu1 }
 0x77b   : > { %v5444_v53 = vpack.c.bf16 %v3251_v44, %v3250_v35  ;;  %v3196_v52 = vadd.f32 %v3752_v10, %v3006_v2 }
 0x77c   : > { %v3754_v37 = vpop.f32.mrf.mxu1 }
 0x77d   : > { %v3755_v11 = vadd.f32 %v3754_v37, %v3753_v9  ;;  %v3252_v15 = vmax.f32 %v3196_v52, 0.0 }
 0x77e   : > { %v3756_v6 = vpop.f32.mrf.mxu1 }
 0x77f   : > { %v3199_v23 = vadd.f32 %v3755_v11, %v3011_v56 }
 0x780   : > { %v3757_v46 = vpop.f32.mrf.mxu1 }
 0x781   : > { %v3253_v48 = vmax.f32 %v3199_v23, 0.0  ;;  %v5446_v50 = vadd.f32 %v3757_v46, %v3756_v6 }
 0x782   : > { %v3759_v19 = vpop.f32.mrf.mxu1 }
 0x783   : > { %v5448_v12 = vpack.c.bf16 %v3253_v48, %v3252_v15 }
 0x784   : > { %v3760_v41 = vpop.f32.mrf.mxu1 }
 0x786   : > { %v3762_v21 = vpop.f32.mrf.mxu1 }
 0x788   : > { %v3763_v58 = vpop.f32.mrf.mxu1 }
 0x78a   : > { %v3765_v55 = vpop.f32.mrf.mxu1 }
 0x78c   : > { %v3766_v59 = vpop.f32.mrf.mxu1 }
 0x78e   : > { %v3768_v34 = vpop.f32.mrf.mxu1 }
 0x790   : > { %v3769_v25 = vpop.f32.mrf.mxu1 }
 0x791   : > { %v3770_v9 = vadd.f32 %v3769_v25, %v3768_v34 }
 0x792   : > { %v3771_v54 = vpop.f32.mrf.mxu1 }
 0x793   : > { %v3220_v6 = vadd.f32 %v3770_v9, %v5432_v29  ;;  %v3204_v29 = vadd.f32 %v5446_v50, %v5440_v42  ;;  %v3274_v42 = vld [vmem:[%s5512_s16] sm:$0xf]  ;;  %v3326_v50 = vpop.permute.xlu0 %3325 }
 0x794   : > { %v3772_v31 = vpop.f32.mrf.mxu1 }
 0x795   : > { %v3773_v1 = vadd.f32 %v3772_v31, %v3771_v54  ;;  %v3258_v34 = vmax.f32 %v3220_v6, 0.0  ;;  %v3319_v54 = vpop.permute.xlu1 %3318  ;;  %v625_v31 = vld [vmem:[%s4332_s27] sm:$0x1] }
 0x796   : > { %v3774_v3 = vpop.f32.mrf.mxu1 }
 0x798   : > { %v3775_v49 = vpop.f32.mrf.mxu1 }
 0x799   : > { %v3776_v51 = vadd.f32 %v3775_v49, %v3774_v3 }
 0x79a   : > { %v3777_v0 = vpop.f32.mrf.mxu1 }
 0x79b   : > { %v3228_v37 = vadd.f32 %v3776_v51, %v5428_v7 }
 0x79c   : > { %v3778_v61 = vpop.f32.mrf.mxu1 }
 0x79d   : > { %v3779_v40 = vadd.f32 %v3778_v61, %v3777_v0  ;;  %v3260_v23 = vmax.f32 %v3228_v37, 0.0 }
 0x79e   : > { %v3780_v39 = vpop.f32.mrf.mxu1 }
 0x79f   : > { %v3231_v35 = vadd.f32 %v3779_v40, %v5430_v32  ;;  %v3761_v32 = vadd.f32 %v3760_v41, %v3759_v19  ;;  %v3254_v41 = vmax.f32 %v3204_v29, 0.0 }
 0x7a0   : > { %v3781_v36 = vpop.f32.mrf.mxu1 }
 0x7a1   : > { %v3782_v14 = vadd.f32 %v3781_v36, %v3780_v39  ;;  %v3261_v52 = vmax.f32 %v3231_v35, 0.0 }
 0x7a2   : > { %v3783_v5 = vpop.f32.mrf.mxu1 }
 0x7a3   : > { %v3236_v28 = vadd.f32 %v3782_v14, %v5424_v17  ;;  %v3764_v17 = vadd.f32 %v3763_v58, %v3762_v21  ;;  %v3271_v15 = vpack.c.bf16 %v3261_v52, %v3260_v23 }
 0x7a4   : > { %v3784_v26 = vpop.f32.mrf.mxu1 }
 0x7a5   : > { %v3785_v43 = vadd.f32 %v3784_v26, %v3783_v5  ;;  %v3212_v48 = vadd.f32 %v3764_v17, %v5436_v13 }
 0x7a6   : > { %v3786_v18 = vpop.f32.mrf.mxu1 }
 0x7a7   : > { %v3239_v24 = vadd.f32 %v3785_v43, %v5426_v33  ;;  %v3767_v33 = vadd.f32 %v3766_v59, %v3765_v55  ;;  %v3256_v55 = vmax.f32 %v3212_v48, 0.0  ;;  %v3327_v59 = vrot.slane %v3326_v50, 7 }
 0x7a8   : > { %v3787_v45 = vpop.f32.mrf.mxu1 }
 0x7a9   : > { %v3788_v60 = vadd.f32 %v3787_v45, %v3786_v18  ;;  %v3263_v44 = vmax.f32 %v3239_v24, 0.0  ;;  %v3215_v46 = vadd.f32 %v3767_v33, %v5438_v22 }
 0x7aa   : > { %v3789_v2 = vpop.f32.mrf.mxu1 }
 0x7ab   : > { %v3244_v62 = vadd.f32 %v3788_v60, %v5420_v63  ;;  %v3262_v63 = vmax.f32 %v3236_v28, 0.0  ;;  %v3257_v21 = vmax.f32 %v3215_v46, 0.0 }
 0x7ac   : > { %v3790_v56 = vpop.f32.mrf.mxu1 }
 0x7ad   : > { %v3791_v27 = vadd.f32 %v3790_v56, %v3789_v2  ;;  %v3264_v16 = vmax.f32 %v3244_v62, 0.0  ;;  %v3272_v11 = vpack.c.bf16 %v3263_v44, %v3262_v63  ;;  %v3269_v19 = vpack.c.bf16 %v3257_v21, %v3256_v55 }
 0x7af   : > { %v3247_v8 = vadd.f32 %v3791_v27, %v5422_v4  ;;  %v3223_v4 = vadd.f32 %v3773_v1, %v5434_v57  ;;  %v3207_v57 = vadd.f32 %v3761_v32, %v5442_v30  ;;  %v3387_v30 = vrot.slane %v5174_v47, 4 }
 0x7b1   : > { %v3265_v20 = vmax.f32 %v3247_v8, 0.0  ;;  %v3259_v7 = vmax.f32 %v3223_v4, 0.0  ;;  %v3255_v22 = vmax.f32 %v3207_v57, 0.0  ;;  %v3388_v25 = vadd.f32 %v3387_v30, %v5174_v47 }
 0x7b3   : > { %v3273_v10 = vpack.c.bf16 %v3265_v20, %v3264_v16  ;;  %v3270_v58 = vpack.c.bf16 %v3259_v7, %v3258_v34  ;;  %v3268_v13 = vpack.c.bf16 %v3255_v22, %v3254_v41  ;;  %v3389_v39 = vrot.slane %v3388_v25, 2 }
 0x7b5   : > { %3982 = vmatpush3.bf16.msra.mxu0 %v3273_v10  ;;  %v3390_v60 = vadd.f32 %v3389_v39, %v3388_v25 }
 0x7b6   : > { %3983 = vmatprep.subr.bf16.mxu0 %v4183_v38 }
 0x7b7   : > { %v3391_v56 = vrot.slane %v3390_v60, 1 }
 0x7b9   : > { %3984 = vmatpush3.bf16.msra.mxu0 %v3272_v11  ;;  %v3392_v27 = vadd.f32 %v3391_v56, %v3390_v60 }
 0x7ba   : > { %3985 = vmatprep.subr.bf16.mxu0 %v4183_v38 }
 0x7bd   : > { %3986 = vmatpush3.bf16.msra.mxu0 %v3271_v15 }
 0x7be   : > { %3987 = vmatprep.subr.bf16.mxu0 %v4183_v38 }
 0x7c1   : > { %3988 = vmatpush3.bf16.msra.mxu0 %v3270_v58 }
 0x7c2   : > { %3989 = vmatprep.subr.bf16.mxu0 %v4183_v38 }
 0x7c5   : > { %3990 = vmatpush3.bf16.msra.mxu0 %v3269_v19 }
 0x7c6   : > { %3991 = vmatprep.subr.bf16.mxu0 %v4183_v38 }
 0x7c9   : > { %3992 = vmatpush3.bf16.msra.mxu0 %v3268_v13 }
 0x7ca   : > { %3993 = vmatprep.subr.bf16.mxu0 %v4183_v38 }
 0x7cd   : > { %3994 = vmatpush3.bf16.msra.mxu0 %v5448_v12 }
 0x7ce   : > { %3995 = vmatprep.subr.bf16.mxu0 %v4183_v38  ;;  %v626_v38 = vld [vmem:[%s4332_s27 + $0x1] sm:$0x1] }
 0x7d1   : > { %3996 = vmatpush3.bf16.msra.mxu0 %v5444_v53 }
 0x7d4   : > { %3998 = vmatmul.mubr.bf16.vlgmr.msra.gmra.mxu0 %v3274_v42 }
 0x894   : > { %v3309_v3 = vpop.f32.mrf.mxu0 }
 0x895   : > { %v3321_v12 = vadd.f32 %v3319_v54, %v3309_v3  ;;  %v3329_v49 = vadd.f32 %v3327_v59, %v3309_v3 }
 0x896   : > { %v3999_v53 = vpop.f32.mrf.mxu0 }
 0x897   : > { %v3330_v0 = vsub.f32 %v625_v31, %v3321_v12  ;;  %v3333_v61 = vrot.slane %v3329_v49, 1 }
 0x898   : > { %v3312_v36 = vpop.f32.mrf.mxu0 }
 0x899   : > { %v3331_v5 = vmul.f32 12.5, %v3330_v0  ;;  %v3335_v26 = vsub.f32 %v626_v38, %v3333_v61 }
 0x89a   : > { %v4000_v18 = vpop.f32.mrf.mxu0 }
 0x89b   : > { %v3336_v45 = vmul.f32 12.5, %v3335_v26  ;;  %v3337_v47 = vmul.f32 %v3331_v5, %v3331_v5 }
 0x89d   : > { %v3338_v2 = vmul.f32 %v3336_v45, %v3336_v45 }
 0x89f   : > { %v3339_v43 = vadd.f32 %v3338_v2, %v3337_v47 }
 0x8a1   : > { %v3340_v14 = vmul.f32 -0.5, %v3339_v43 }
 0x8a3   : > { %v3571_v62 = vadd.f32 3.2135801, %v3340_v14 }
 0x8a5   : > { %v3393_v40 = vsub.f32 %v3571_v62, %v3392_v27 }
 0x8a7   : > { %3394 = vst [vmem:[%s618_s1] sm:$0x1] %v3393_v40 }
 0x8a8 PF: > { %s5532_s29 = sld [smem:[#allocation4_spill]] }
 0x8a9   : > { %s5533_s27 = sld [smem:[#allocation3_spill]] }
 0x8aa   : > { %s5534_s28 = sld [smem:[#allocation5_spill]] }
 0x8ae   : > { %p25_p9 = scmp.ge.s32.totalorder %s5532_s29, 4  }
 0x8b0   :  { %27 = sbr.rel (!%p25_p9) target bundleno = 6 (0x6), region = 165 }

</bundles_post_ra>
